<compile_context>
chip_gen: v6e
topology: v6e:2x2x1
jax: 0.10.0
libtpu: 0.0.40
codegen_flags: <defaults>
</compile_context>

<pallas_src>
import jax
import jax.numpy as jnp
from jax.experimental import pallas as pl
from jax.experimental.pallas import tpu as pltpu

HIDDEN = 32
NUM_CLASSES = 5

# f32 slab row offsets (8-aligned; requires 2*B <= 8)
VS_WIH0 = 0    # wih0 rows (2B, 4H)
VS_B0 = 8      # layer-0 bias rows (2B, 4H)
VS_B1 = 16     # layer-1 bias rows (2B, 4H)
VS_FCB = 24    # fc bias, lane-padded (1, 4H)
VS_ROWS = 32


def lstm_model_kernel(x_ref, attn_ref, vslab_ref, wslab_ref, out_ref):
    B, S = x_ref.shape
    H = vslab_ref.shape[1] // 4
    f32 = jnp.float32
    bf16 = jnp.bfloat16

    # ---------------- packed parameter views (static, aligned slices) ----------------
    wih0_rows = vslab_ref[VS_WIH0:VS_WIH0 + 2 * B, :]   # (2B, 4H) f32: [wih0_f x B ; wih0_b x B]
    b0_rows = vslab_ref[VS_B0:VS_B0 + 2 * B, :]         # (2B, 4H) f32: b_ih + b_hh per direction
    b1_rows = vslab_ref[VS_B1:VS_B1 + 2 * B, :]         # (2B, 4H) f32
    fc_b = vslab_ref[VS_FCB:VS_FCB + 1, :]              # (1, 4H) f32, lanes >= C are zero

    whh0 = wslab_ref[0:2 * H, :]                        # (2H, 4H) bf16: [whh0_f ; whh0_b]
    wih1_f = wslab_ref[2 * H:4 * H, :]                  # (2H, 4H) bf16
    wih1_b = wslab_ref[4 * H:6 * H, :]                  # (2H, 4H) bf16
    whh1 = wslab_ref[6 * H:8 * H, :]                    # (2H, 4H) bf16: [whh1_f ; whh1_b]
    fc_w = wslab_ref[8 * H:9 * H, :]                    # (H, 4H) bf16, lanes >= C are zero

    # ---------------- MultiheadAttention(embed_dim=1, num_heads=1) ----------------
    x = x_ref[...]                                      # (B, S) f32
    wq, wk, wv = attn_ref[0], attn_ref[1], attn_ref[2]
    bq, bk, bv = attn_ref[3], attn_ref[4], attn_ref[5]
    wo, bo = attn_ref[6], attn_ref[7]
    q = x * wq + bq
    k = x * wk + bk
    v = x * wv + bv

    # Softmax over the key (batch) axis, explicitly unrolled (B static & tiny); pure 2-D math.
    s_rows = [q * k[j:j + 1, :] for j in range(B)]      # s_rows[j][i, s] = q[i,s] * k[j,s]
    m = s_rows[0]
    for j in range(1, B):
        m = jnp.maximum(m, s_rows[j])
    e_rows = [jnp.exp(s - m) for s in s_rows]
    denom = e_rows[0]
    for j in range(1, B):
        denom = denom + e_rows[j]
    ctx = e_rows[0] * v[0:1, :]
    for j in range(1, B):
        ctx = ctx + e_rows[j] * v[j:j + 1, :]
    x_att = (ctx / denom) * wo + bo                     # (B, S)

    # ---------------- merged bidirectional LSTM cell ----------------
    # State layout: rows [0:B) = forward direction, rows [B:2B) = backward direction.
    # h_cat is (2B, 2H) with the opposite direction's lane-half zeroed so that a single
    # matmul against vstack(whh_f, whh_b) computes both recurrent projections at once.
    row = jax.lax.broadcasted_iota(jnp.int32, (2 * B, 2 * H), 0)
    col = jax.lax.broadcasted_iota(jnp.int32, (2 * B, 2 * H), 1)
    dir_mask = (row < B) == (col < H)                   # block-diagonal keep-mask

    def merged_cell(gin_t, h_cat, c_cat, whh_bf):
        # gin_t: (2B, 4H) f32, h_cat: (2B, 2H) f32, c_cat: (2B, H) f32, whh_bf: (2H, 4H) bf16
        gates = gin_t + jnp.dot(h_cat.astype(bf16), whh_bf,
                                preferred_element_type=f32)      # (2B, 4H): 1 MXU push
        sg = jax.nn.sigmoid(gates)                               # 1 full-width EUP push
        th = jnp.tanh(gates)                                     # 1 full-width EUP push
        i_g = sg[:, 0 * H:1 * H]
        f_g = sg[:, 1 * H:2 * H]
        g_g = th[:, 2 * H:3 * H]
        o_g = sg[:, 3 * H:4 * H]
        c_new = f_g * c_cat + i_g * g_g                          # (2B, H)
        h_new = o_g * jnp.tanh(c_new)                            # (2B, H)
        h_cat_new = jnp.where(dir_mask,
                              jnp.concatenate([h_new, h_new], axis=1), 0.0)
        return h_new, h_cat_new, c_new

    # ---------------- LSTM layer 0 (Din = 1), fwd+bwd merged, fully unrolled ----------------
    h_cat = jnp.zeros((2 * B, 2 * H), f32)
    c_cat = jnp.zeros((2 * B, H), f32)
    h0_steps = []
    for t in range(S):
        tb = S - 1 - t
        # Din=1 input projection is an outer product (no MXU); stacked fwd(t) / bwd(tb).
        x_t = jnp.concatenate([x_att[:, t:t + 1], x_att[:, tb:tb + 1]], axis=0)  # (2B, 1)
        gin_t = x_t * wih0_rows + b0_rows                                        # (2B, 4H)
        h_new, h_cat, c_cat = merged_cell(gin_t, h_cat, c_cat, whh0)
        h0_steps.append(h_new)   # rows [0:B) = fwd output at t, rows [B:2B) = bwd output at tb

    # ---------------- layer-1 input projection, hoisted out of the recurrence ----------------
    # Layer-0 output sequence stays in vregs (no scratch, no masked scatter).
    hf = jnp.concatenate([h0_steps[t][0:B, :] for t in range(S)], axis=0)            # (S*B, H) time-major fwd
    hb = jnp.concatenate([h0_steps[S - 1 - t][B:2 * B, :] for t in range(S)], axis=0)  # (S*B, H) time-major bwd
    seq01 = jnp.concatenate([hf, hb], axis=1).astype(bf16)                           # (S*B, 2H)
    gin1_f = jnp.dot(seq01, wih1_f, preferred_element_type=f32)                      # (S*B, 4H)
    gin1_b = jnp.dot(seq01, wih1_b, preferred_element_type=f32)                      # (S*B, 4H)

    # ---------------- LSTM layer 1 (Din = 2H), fwd+bwd merged ----------------
    h_cat = jnp.zeros((2 * B, 2 * H), f32)
    c_cat = jnp.zeros((2 * B, H), f32)
    h_last = None
    for t in range(S):
        tb = S - 1 - t
        gin_t = jnp.concatenate([gin1_f[t * B:(t + 1) * B, :],
                                 gin1_b[tb * B:(tb + 1) * B, :]], axis=0) + b1_rows  # (2B, 4H)
        h_last, h_cat, c_cat = merged_cell(gin_t, h_cat, c_cat, whh1)

    # After the last step: rows [0:B) = ht[-2] (fwd final), rows [B:2B) = ht[-1] (bwd final).
    h_avg = ((h_last[0:B, :] + h_last[B:2 * B, :]) * 0.5).astype(bf16)               # (B, H)

    # ---------------- head: fc, lane-padded to 4H (=128) for an unmasked store ----------------
    out_ref[...] = jnp.dot(h_avg, fc_w, preferred_element_type=f32) + fc_b


@jax.jit
def lstm_model_forward(x, attn, vslab, wslab):
    B, S = x.shape
    vmem = pl.BlockSpec(memory_space=pltpu.MemorySpace.VMEM)
    smem = pl.BlockSpec(memory_space=pltpu.MemorySpace.SMEM)
    out = pl.pallas_call(
        lstm_model_kernel,
        out_shape=jax.ShapeDtypeStruct((B, 4 * HIDDEN), jnp.float32),
        in_specs=[vmem, smem, vmem, vmem],
        out_specs=vmem,
    )(x, attn, vslab, wslab)
    return out[:, :NUM_CLASSES]


# --------------------------------------------------------------------------------------
# Deterministic parameter init (shapes follow the PyTorch module; weights pre-transposed as
# (Din, 4H) / (H, 4H) / (H, C), with a leading direction axis for the LSTM).
# --------------------------------------------------------------------------------------
def init_params(key, hidden=HIDDEN, num_classes=NUM_CLASSES):
    H = hidden
    keys = iter(jax.random.split(key, 32))

    def u(k, shape, scale):
        return jax.random.uniform(k, shape, jnp.float32, -scale, scale)

    # MHA(embed_dim=1): [wq, wk, wv, bq, bk, bv, w_out, b_out]
    attn = jax.random.normal(next(keys), (8,), jnp.float32) * 0.5

    scale = 1.0 / (H ** 0.5)

    def lstm_layer(din):
        wih = jnp.stack([u(next(keys), (din, 4 * H), scale) for _ in range(2)])     # (2, Din, 4H)
        whh = jnp.stack([u(next(keys), (H, 4 * H), scale) for _ in range(2)])       # (2, H, 4H)
        b = jnp.stack([u(next(keys), (1, 4 * H), scale) + u(next(keys), (1, 4 * H), scale)
                       for _ in range(2)])                                          # (2, 1, 4H) = b_ih + b_hh
        return wih, whh, b

    lstm0 = lstm_layer(1)
    lstm1 = lstm_layer(2 * H)

    fc_w = u(next(keys), (H, num_classes), scale)    # (H, C) pre-transposed
    fc_b = u(next(keys), (1, num_classes), scale)
    return {"attn": attn, "lstm": (lstm0, lstm1), "fc": (fc_w, fc_b)}


def pack_params(params, batch, hidden=HIDDEN, num_classes=NUM_CLASSES):
    """Pack all parameters into one bf16 matmul-weight slab + one f32 bias/row slab (host-side)."""
    H, C, B = hidden, num_classes, batch
    assert 2 * B <= 8, "f32 slab row layout assumes 2*B <= 8 (one sublane group per section)"

    attn = params["attn"]
    (wih0, whh0, b0), (wih1, whh1, b1) = params["lstm"]
    fc_w, fc_b = params["fc"]

    def dir_rows(p):  # (2, 1, 4H) -> (2B, 4H): fwd broadcast to B rows, then bwd
        return jnp.concatenate([jnp.broadcast_to(p[0], (B, 4 * H)),
                                jnp.broadcast_to(p[1], (B, 4 * H))], axis=0)

    fc_b_pad = jnp.zeros((1, 4 * H), jnp.float32).at[:, :C].set(fc_b)

    vslab = jnp.zeros((VS_ROWS, 4 * H), jnp.float32)
    vslab = vslab.at[VS_WIH0:VS_WIH0 + 2 * B].set(dir_rows(wih0))
    vslab = vslab.at[VS_B0:VS_B0 + 2 * B].set(dir_rows(b0))
    vslab = vslab.at[VS_B1:VS_B1 + 2 * B].set(dir_rows(b1))
    vslab = vslab.at[VS_FCB:VS_FCB + 1].set(fc_b_pad)

    whh0_stk = jnp.concatenate([whh0[0], whh0[1]], axis=0)          # (2H, 4H)
    whh1_stk = jnp.concatenate([whh1[0], whh1[1]], axis=0)          # (2H, 4H)
    fc_w_pad = jnp.zeros((H, 4 * H), jnp.float32).at[:, :C].set(fc_w)
    wslab = jnp.concatenate([whh0_stk, wih1[0], wih1[1], whh1_stk, fc_w_pad],
                            axis=0).astype(jnp.bfloat16)            # (9H, 4H) bf16

    return attn, vslab, wslab


if __name__ == "__main__":
    key = jax.random.PRNGKey(0)
    k_x, k_p = jax.random.split(key)

    B, S = 2, 8
    x = jax.random.normal(k_x, (B, S), dtype=jnp.float32)
    params = init_params(k_p)
    attn, vslab, wslab = pack_params(params, B)

    out = lstm_model_forward(x, attn, vslab, wslab)
    out = jax.block_until_ready(out)
    assert out.shape == (B, NUM_CLASSES), out.shape
    assert jnp.all(jnp.isfinite(out))
    print("KERNEL_OK")
</pallas_src>

<mosaic_0001>
module attributes {stable_mosaic.version = 11 : i64} {
  func.func @lstm_model_kernel(%arg0: memref<2x8xf32, #tpu.memory_space<vmem>>, %arg1: memref<8xf32, #tpu.memory_space<smem>>, %arg2: memref<32x128xf32, #tpu.memory_space<vmem>>, %arg3: memref<288x128xbf16, #tpu.memory_space<vmem>>, %arg4: memref<2x128xf32, #tpu.memory_space<vmem>>) attributes {dimension_semantics = [], scalar_prefetch = 0 : i64, scratch_operands = 0 : i64, tpu.core_type = #tpu.core_type<tc>} {
    %c0 = arith.constant 0 : index
    %c0_0 = arith.constant 0 : index
    %0 = vector.load %arg2[%c0, %c0_0] : memref<32x128xf32, #tpu.memory_space<vmem>>, vector<4x128xf32>
    %c8 = arith.constant 8 : index
    %c0_1 = arith.constant 0 : index
    %1 = vector.load %arg2[%c8, %c0_1] : memref<32x128xf32, #tpu.memory_space<vmem>>, vector<4x128xf32>
    %c16 = arith.constant 16 : index
    %c0_2 = arith.constant 0 : index
    %2 = vector.load %arg2[%c16, %c0_2] : memref<32x128xf32, #tpu.memory_space<vmem>>, vector<4x128xf32>
    %c24 = arith.constant 24 : index
    %c0_3 = arith.constant 0 : index
    %3 = vector.load %arg2[%c24, %c0_3] : memref<32x128xf32, #tpu.memory_space<vmem>>, vector<1x128xf32>
    %c0_4 = arith.constant 0 : index
    %c0_5 = arith.constant 0 : index
    %4 = vector.load %arg3[%c0_4, %c0_5] : memref<288x128xbf16, #tpu.memory_space<vmem>>, vector<64x128xbf16>
    %c64 = arith.constant 64 : index
    %c0_6 = arith.constant 0 : index
    %5 = vector.load %arg3[%c64, %c0_6] : memref<288x128xbf16, #tpu.memory_space<vmem>>, vector<64x128xbf16>
    %c128 = arith.constant 128 : index
    %c0_7 = arith.constant 0 : index
    %6 = vector.load %arg3[%c128, %c0_7] : memref<288x128xbf16, #tpu.memory_space<vmem>>, vector<64x128xbf16>
    %c192 = arith.constant 192 : index
    %c0_8 = arith.constant 0 : index
    %7 = vector.load %arg3[%c192, %c0_8] : memref<288x128xbf16, #tpu.memory_space<vmem>>, vector<64x128xbf16>
    %c256 = arith.constant 256 : index
    %c0_9 = arith.constant 0 : index
    %8 = vector.load %arg3[%c256, %c0_9] : memref<288x128xbf16, #tpu.memory_space<vmem>>, vector<32x128xbf16>
    %c0_10 = arith.constant 0 : index
    %c0_11 = arith.constant 0 : index
    %9 = vector.load %arg0[%c0_10, %c0_11] : memref<2x8xf32, #tpu.memory_space<vmem>>, vector<2x8xf32>
    %c0_12 = arith.constant 0 : index
    %10 = memref.load %arg1[%c0_12] : memref<8xf32, #tpu.memory_space<smem>>
    %c1 = arith.constant 1 : index
    %11 = memref.load %arg1[%c1] : memref<8xf32, #tpu.memory_space<smem>>
    %c2 = arith.constant 2 : index
    %12 = memref.load %arg1[%c2] : memref<8xf32, #tpu.memory_space<smem>>
    %c3 = arith.constant 3 : index
    %13 = memref.load %arg1[%c3] : memref<8xf32, #tpu.memory_space<smem>>
    %c4 = arith.constant 4 : index
    %14 = memref.load %arg1[%c4] : memref<8xf32, #tpu.memory_space<smem>>
    %c5 = arith.constant 5 : index
    %15 = memref.load %arg1[%c5] : memref<8xf32, #tpu.memory_space<smem>>
    %c6 = arith.constant 6 : index
    %16 = memref.load %arg1[%c6] : memref<8xf32, #tpu.memory_space<smem>>
    %c7 = arith.constant 7 : index
    %17 = memref.load %arg1[%c7] : memref<8xf32, #tpu.memory_space<smem>>
    %18 = vector.broadcast %10 : f32 to vector<2x8xf32>
    %19 = arith.mulf %9, %18 : vector<2x8xf32>
    %20 = vector.broadcast %13 : f32 to vector<2x8xf32>
    %21 = arith.addf %19, %20 : vector<2x8xf32>
    %22 = vector.broadcast %11 : f32 to vector<2x8xf32>
    %23 = arith.mulf %9, %22 : vector<2x8xf32>
    %24 = vector.broadcast %14 : f32 to vector<2x8xf32>
    %25 = arith.addf %23, %24 : vector<2x8xf32>
    %26 = vector.broadcast %12 : f32 to vector<2x8xf32>
    %27 = arith.mulf %9, %26 : vector<2x8xf32>
    %28 = vector.broadcast %15 : f32 to vector<2x8xf32>
    %29 = arith.addf %27, %28 : vector<2x8xf32>
    %30 = vector.extract_strided_slice %25 {offsets = [0, 0], sizes = [1, 8], strides = [1, 1]} : vector<2x8xf32> to vector<1x8xf32>
    %31 = vector.broadcast %30 : vector<1x8xf32> to vector<2x8xf32>
    %32 = arith.mulf %21, %31 : vector<2x8xf32>
    %33 = vector.extract_strided_slice %25 {offsets = [1, 0], sizes = [1, 8], strides = [1, 1]} : vector<2x8xf32> to vector<1x8xf32>
    %34 = vector.broadcast %33 : vector<1x8xf32> to vector<2x8xf32>
    %35 = arith.mulf %21, %34 : vector<2x8xf32>
    %36 = arith.maximumf %32, %35 : vector<2x8xf32>
    %37 = arith.subf %32, %36 : vector<2x8xf32>
    %38 = math.exp %37 : vector<2x8xf32>
    %39 = arith.subf %35, %36 : vector<2x8xf32>
    %40 = math.exp %39 : vector<2x8xf32>
    %41 = arith.addf %38, %40 : vector<2x8xf32>
    %42 = vector.extract_strided_slice %29 {offsets = [0, 0], sizes = [1, 8], strides = [1, 1]} : vector<2x8xf32> to vector<1x8xf32>
    %43 = vector.broadcast %42 : vector<1x8xf32> to vector<2x8xf32>
    %44 = arith.mulf %38, %43 : vector<2x8xf32>
    %45 = vector.extract_strided_slice %29 {offsets = [1, 0], sizes = [1, 8], strides = [1, 1]} : vector<2x8xf32> to vector<1x8xf32>
    %46 = vector.broadcast %45 : vector<1x8xf32> to vector<2x8xf32>
    %47 = arith.mulf %40, %46 : vector<2x8xf32>
    %48 = arith.addf %44, %47 : vector<2x8xf32>
    %49 = arith.divf %48, %41 : vector<2x8xf32>
    %50 = vector.broadcast %16 : f32 to vector<2x8xf32>
    %51 = arith.mulf %49, %50 : vector<2x8xf32>
    %52 = vector.broadcast %17 : f32 to vector<2x8xf32>
    %53 = arith.addf %51, %52 : vector<2x8xf32>
    %54 = tpu.iota {dimensions = array<i32: 0>} : vector<4x64xi32>
    %55 = tpu.iota {dimensions = array<i32: 1>} : vector<4x64xi32>
    %c2_i32 = arith.constant 2 : i32
    %56 = vector.broadcast %c2_i32 : i32 to vector<4x64xi32>
    %57 = arith.cmpi slt, %54, %56 : vector<4x64xi32>
    %c32_i32 = arith.constant 32 : i32
    %58 = vector.broadcast %c32_i32 : i32 to vector<4x64xi32>
    %59 = arith.cmpi slt, %55, %58 : vector<4x64xi32>
    %60 = arith.xori %57, %59 : vector<4x64xi1>
    %cst = arith.constant dense<true> : vector<4x64xi1>
    %61 = arith.xori %60, %cst : vector<4x64xi1>
    %cst_13 = arith.constant 0.000000e+00 : f32
    %62 = vector.broadcast %cst_13 : f32 to vector<4x64xf32>
    %cst_14 = arith.constant 0.000000e+00 : f32
    %63 = vector.broadcast %cst_14 : f32 to vector<4x32xf32>
    %64 = vector.extract_strided_slice %53 {offsets = [0, 0], sizes = [2, 1], strides = [1, 1]} : vector<2x8xf32> to vector<2x1xf32>
    %65 = vector.extract_strided_slice %53 {offsets = [0, 7], sizes = [2, 1], strides = [1, 1]} : vector<2x8xf32> to vector<2x1xf32>
    %66 = tpu.concatenate %64, %65 in 0 : vector<2x1xf32>, vector<2x1xf32> -> vector<4x1xf32>
    %67 = vector.broadcast %66 : vector<4x1xf32> to vector<4x128xf32>
    %68 = arith.mulf %67, %0 : vector<4x128xf32>
    %69 = arith.addf %68, %1 : vector<4x128xf32>
    %70 = arith.truncf %62 : vector<4x64xf32> to vector<4x64xbf16>
    %cst_15 = arith.constant dense<0.000000e+00> : vector<4x128xf32>
    %71 = tpu.matmul %70, %4, %cst_15 {dimension_numbers = #tpu.dot_dimension_numbers<[1], [0], [0], [1], [0, 0, 1, 1], [], []>} : vector<4x64xbf16>, vector<64x128xbf16>, vector<4x128xf32> -> vector<4x128xf32>
    %72 = arith.addf %69, %71 : vector<4x128xf32>
    %73 = arith.negf %72 : vector<4x128xf32>
    %74 = math.exp %73 : vector<4x128xf32>
    %cst_16 = arith.constant 1.000000e+00 : f32
    %75 = vector.broadcast %cst_16 : f32 to vector<4x128xf32>
    %76 = arith.addf %75, %74 : vector<4x128xf32>
    %77 = arith.divf %75, %76 : vector<4x128xf32>
    %78 = math.tanh %72 : vector<4x128xf32>
    %79 = vector.extract_strided_slice %77 {offsets = [0, 0], sizes = [4, 32], strides = [1, 1]} : vector<4x128xf32> to vector<4x32xf32>
    %80 = vector.extract_strided_slice %77 {offsets = [0, 32], sizes = [4, 32], strides = [1, 1]} : vector<4x128xf32> to vector<4x32xf32>
    %81 = vector.extract_strided_slice %78 {offsets = [0, 64], sizes = [4, 32], strides = [1, 1]} : vector<4x128xf32> to vector<4x32xf32>
    %82 = vector.extract_strided_slice %77 {offsets = [0, 96], sizes = [4, 32], strides = [1, 1]} : vector<4x128xf32> to vector<4x32xf32>
    %83 = arith.mulf %80, %63 : vector<4x32xf32>
    %84 = arith.mulf %79, %81 : vector<4x32xf32>
    %85 = arith.addf %83, %84 : vector<4x32xf32>
    %86 = math.tanh %85 : vector<4x32xf32>
    %87 = arith.mulf %82, %86 : vector<4x32xf32>
    %88 = tpu.concatenate %87, %87 in 1 : vector<4x32xf32>, vector<4x32xf32> -> vector<4x64xf32>
    %cst_17 = arith.constant 0.000000e+00 : f32
    %89 = vector.broadcast %cst_17 : f32 to vector<4x64xf32>
    %90 = arith.select %61, %88, %89 : vector<4x64xi1>, vector<4x64xf32>
    %91 = vector.extract_strided_slice %53 {offsets = [0, 1], sizes = [2, 1], strides = [1, 1]} : vector<2x8xf32> to vector<2x1xf32>
    %92 = vector.extract_strided_slice %53 {offsets = [0, 6], sizes = [2, 1], strides = [1, 1]} : vector<2x8xf32> to vector<2x1xf32>
    %93 = tpu.concatenate %91, %92 in 0 : vector<2x1xf32>, vector<2x1xf32> -> vector<4x1xf32>
    %94 = vector.broadcast %93 : vector<4x1xf32> to vector<4x128xf32>
    %95 = arith.mulf %94, %0 : vector<4x128xf32>
    %96 = arith.addf %95, %1 : vector<4x128xf32>
    %97 = arith.truncf %90 : vector<4x64xf32> to vector<4x64xbf16>
    %cst_18 = arith.constant dense<0.000000e+00> : vector<4x128xf32>
    %98 = tpu.matmul %97, %4, %cst_18 {dimension_numbers = #tpu.dot_dimension_numbers<[1], [0], [0], [1], [0, 0, 1, 1], [], []>} : vector<4x64xbf16>, vector<64x128xbf16>, vector<4x128xf32> -> vector<4x128xf32>
    %99 = arith.addf %96, %98 : vector<4x128xf32>
    %100 = arith.negf %99 : vector<4x128xf32>
    %101 = math.exp %100 : vector<4x128xf32>
    %cst_19 = arith.constant 1.000000e+00 : f32
    %102 = vector.broadcast %cst_19 : f32 to vector<4x128xf32>
    %103 = arith.addf %102, %101 : vector<4x128xf32>
    %104 = arith.divf %102, %103 : vector<4x128xf32>
    %105 = math.tanh %99 : vector<4x128xf32>
    %106 = vector.extract_strided_slice %104 {offsets = [0, 0], sizes = [4, 32], strides = [1, 1]} : vector<4x128xf32> to vector<4x32xf32>
    %107 = vector.extract_strided_slice %104 {offsets = [0, 32], sizes = [4, 32], strides = [1, 1]} : vector<4x128xf32> to vector<4x32xf32>
    %108 = vector.extract_strided_slice %105 {offsets = [0, 64], sizes = [4, 32], strides = [1, 1]} : vector<4x128xf32> to vector<4x32xf32>
    %109 = vector.extract_strided_slice %104 {offsets = [0, 96], sizes = [4, 32], strides = [1, 1]} : vector<4x128xf32> to vector<4x32xf32>
    %110 = arith.mulf %107, %85 : vector<4x32xf32>
    %111 = arith.mulf %106, %108 : vector<4x32xf32>
    %112 = arith.addf %110, %111 : vector<4x32xf32>
    %113 = math.tanh %112 : vector<4x32xf32>
    %114 = arith.mulf %109, %113 : vector<4x32xf32>
    %115 = tpu.concatenate %114, %114 in 1 : vector<4x32xf32>, vector<4x32xf32> -> vector<4x64xf32>
    %cst_20 = arith.constant 0.000000e+00 : f32
    %116 = vector.broadcast %cst_20 : f32 to vector<4x64xf32>
    %117 = arith.select %61, %115, %116 : vector<4x64xi1>, vector<4x64xf32>
    %118 = vector.extract_strided_slice %53 {offsets = [0, 2], sizes = [2, 1], strides = [1, 1]} : vector<2x8xf32> to vector<2x1xf32>
    %119 = vector.extract_strided_slice %53 {offsets = [0, 5], sizes = [2, 1], strides = [1, 1]} : vector<2x8xf32> to vector<2x1xf32>
    %120 = tpu.concatenate %118, %119 in 0 : vector<2x1xf32>, vector<2x1xf32> -> vector<4x1xf32>
    %121 = vector.broadcast %120 : vector<4x1xf32> to vector<4x128xf32>
    %122 = arith.mulf %121, %0 : vector<4x128xf32>
    %123 = arith.addf %122, %1 : vector<4x128xf32>
    %124 = arith.truncf %117 : vector<4x64xf32> to vector<4x64xbf16>
    %cst_21 = arith.constant dense<0.000000e+00> : vector<4x128xf32>
    %125 = tpu.matmul %124, %4, %cst_21 {dimension_numbers = #tpu.dot_dimension_numbers<[1], [0], [0], [1], [0, 0, 1, 1], [], []>} : vector<4x64xbf16>, vector<64x128xbf16>, vector<4x128xf32> -> vector<4x128xf32>
    %126 = arith.addf %123, %125 : vector<4x128xf32>
    %127 = arith.negf %126 : vector<4x128xf32>
    %128 = math.exp %127 : vector<4x128xf32>
    %cst_22 = arith.constant 1.000000e+00 : f32
    %129 = vector.broadcast %cst_22 : f32 to vector<4x128xf32>
    %130 = arith.addf %129, %128 : vector<4x128xf32>
    %131 = arith.divf %129, %130 : vector<4x128xf32>
    %132 = math.tanh %126 : vector<4x128xf32>
    %133 = vector.extract_strided_slice %131 {offsets = [0, 0], sizes = [4, 32], strides = [1, 1]} : vector<4x128xf32> to vector<4x32xf32>
    %134 = vector.extract_strided_slice %131 {offsets = [0, 32], sizes = [4, 32], strides = [1, 1]} : vector<4x128xf32> to vector<4x32xf32>
    %135 = vector.extract_strided_slice %132 {offsets = [0, 64], sizes = [4, 32], strides = [1, 1]} : vector<4x128xf32> to vector<4x32xf32>
    %136 = vector.extract_strided_slice %131 {offsets = [0, 96], sizes = [4, 32], strides = [1, 1]} : vector<4x128xf32> to vector<4x32xf32>
    %137 = arith.mulf %134, %112 : vector<4x32xf32>
    %138 = arith.mulf %133, %135 : vector<4x32xf32>
    %139 = arith.addf %137, %138 : vector<4x32xf32>
    %140 = math.tanh %139 : vector<4x32xf32>
    %141 = arith.mulf %136, %140 : vector<4x32xf32>
    %142 = tpu.concatenate %141, %141 in 1 : vector<4x32xf32>, vector<4x32xf32> -> vector<4x64xf32>
    %cst_23 = arith.constant 0.000000e+00 : f32
    %143 = vector.broadcast %cst_23 : f32 to vector<4x64xf32>
    %144 = arith.select %61, %142, %143 : vector<4x64xi1>, vector<4x64xf32>
    %145 = vector.extract_strided_slice %53 {offsets = [0, 3], sizes = [2, 1], strides = [1, 1]} : vector<2x8xf32> to vector<2x1xf32>
    %146 = vector.extract_strided_slice %53 {offsets = [0, 4], sizes = [2, 1], strides = [1, 1]} : vector<2x8xf32> to vector<2x1xf32>
    %147 = tpu.concatenate %145, %146 in 0 : vector<2x1xf32>, vector<2x1xf32> -> vector<4x1xf32>
    %148 = vector.broadcast %147 : vector<4x1xf32> to vector<4x128xf32>
    %149 = arith.mulf %148, %0 : vector<4x128xf32>
    %150 = arith.addf %149, %1 : vector<4x128xf32>
    %151 = arith.truncf %144 : vector<4x64xf32> to vector<4x64xbf16>
    %cst_24 = arith.constant dense<0.000000e+00> : vector<4x128xf32>
    %152 = tpu.matmul %151, %4, %cst_24 {dimension_numbers = #tpu.dot_dimension_numbers<[1], [0], [0], [1], [0, 0, 1, 1], [], []>} : vector<4x64xbf16>, vector<64x128xbf16>, vector<4x128xf32> -> vector<4x128xf32>
    %153 = arith.addf %150, %152 : vector<4x128xf32>
    %154 = arith.negf %153 : vector<4x128xf32>
    %155 = math.exp %154 : vector<4x128xf32>
    %cst_25 = arith.constant 1.000000e+00 : f32
    %156 = vector.broadcast %cst_25 : f32 to vector<4x128xf32>
    %157 = arith.addf %156, %155 : vector<4x128xf32>
    %158 = arith.divf %156, %157 : vector<4x128xf32>
    %159 = math.tanh %153 : vector<4x128xf32>
    %160 = vector.extract_strided_slice %158 {offsets = [0, 0], sizes = [4, 32], strides = [1, 1]} : vector<4x128xf32> to vector<4x32xf32>
    %161 = vector.extract_strided_slice %158 {offsets = [0, 32], sizes = [4, 32], strides = [1, 1]} : vector<4x128xf32> to vector<4x32xf32>
    %162 = vector.extract_strided_slice %159 {offsets = [0, 64], sizes = [4, 32], strides = [1, 1]} : vector<4x128xf32> to vector<4x32xf32>
    %163 = vector.extract_strided_slice %158 {offsets = [0, 96], sizes = [4, 32], strides = [1, 1]} : vector<4x128xf32> to vector<4x32xf32>
    %164 = arith.mulf %161, %139 : vector<4x32xf32>
    %165 = arith.mulf %160, %162 : vector<4x32xf32>
    %166 = arith.addf %164, %165 : vector<4x32xf32>
    %167 = math.tanh %166 : vector<4x32xf32>
    %168 = arith.mulf %163, %167 : vector<4x32xf32>
    %169 = tpu.concatenate %168, %168 in 1 : vector<4x32xf32>, vector<4x32xf32> -> vector<4x64xf32>
    %cst_26 = arith.constant 0.000000e+00 : f32
    %170 = vector.broadcast %cst_26 : f32 to vector<4x64xf32>
    %171 = arith.select %61, %169, %170 : vector<4x64xi1>, vector<4x64xf32>
    %172 = vector.extract_strided_slice %53 {offsets = [0, 4], sizes = [2, 1], strides = [1, 1]} : vector<2x8xf32> to vector<2x1xf32>
    %173 = vector.extract_strided_slice %53 {offsets = [0, 3], sizes = [2, 1], strides = [1, 1]} : vector<2x8xf32> to vector<2x1xf32>
    %174 = tpu.concatenate %172, %173 in 0 : vector<2x1xf32>, vector<2x1xf32> -> vector<4x1xf32>
    %175 = vector.broadcast %174 : vector<4x1xf32> to vector<4x128xf32>
    %176 = arith.mulf %175, %0 : vector<4x128xf32>
    %177 = arith.addf %176, %1 : vector<4x128xf32>
    %178 = arith.truncf %171 : vector<4x64xf32> to vector<4x64xbf16>
    %cst_27 = arith.constant dense<0.000000e+00> : vector<4x128xf32>
    %179 = tpu.matmul %178, %4, %cst_27 {dimension_numbers = #tpu.dot_dimension_numbers<[1], [0], [0], [1], [0, 0, 1, 1], [], []>} : vector<4x64xbf16>, vector<64x128xbf16>, vector<4x128xf32> -> vector<4x128xf32>
    %180 = arith.addf %177, %179 : vector<4x128xf32>
    %181 = arith.negf %180 : vector<4x128xf32>
    %182 = math.exp %181 : vector<4x128xf32>
    %cst_28 = arith.constant 1.000000e+00 : f32
    %183 = vector.broadcast %cst_28 : f32 to vector<4x128xf32>
    %184 = arith.addf %183, %182 : vector<4x128xf32>
    %185 = arith.divf %183, %184 : vector<4x128xf32>
    %186 = math.tanh %180 : vector<4x128xf32>
    %187 = vector.extract_strided_slice %185 {offsets = [0, 0], sizes = [4, 32], strides = [1, 1]} : vector<4x128xf32> to vector<4x32xf32>
    %188 = vector.extract_strided_slice %185 {offsets = [0, 32], sizes = [4, 32], strides = [1, 1]} : vector<4x128xf32> to vector<4x32xf32>
    %189 = vector.extract_strided_slice %186 {offsets = [0, 64], sizes = [4, 32], strides = [1, 1]} : vector<4x128xf32> to vector<4x32xf32>
    %190 = vector.extract_strided_slice %185 {offsets = [0, 96], sizes = [4, 32], strides = [1, 1]} : vector<4x128xf32> to vector<4x32xf32>
    %191 = arith.mulf %188, %166 : vector<4x32xf32>
    %192 = arith.mulf %187, %189 : vector<4x32xf32>
    %193 = arith.addf %191, %192 : vector<4x32xf32>
    %194 = math.tanh %193 : vector<4x32xf32>
    %195 = arith.mulf %190, %194 : vector<4x32xf32>
    %196 = tpu.concatenate %195, %195 in 1 : vector<4x32xf32>, vector<4x32xf32> -> vector<4x64xf32>
    %cst_29 = arith.constant 0.000000e+00 : f32
    %197 = vector.broadcast %cst_29 : f32 to vector<4x64xf32>
    %198 = arith.select %61, %196, %197 : vector<4x64xi1>, vector<4x64xf32>
    %199 = vector.extract_strided_slice %53 {offsets = [0, 5], sizes = [2, 1], strides = [1, 1]} : vector<2x8xf32> to vector<2x1xf32>
    %200 = vector.extract_strided_slice %53 {offsets = [0, 2], sizes = [2, 1], strides = [1, 1]} : vector<2x8xf32> to vector<2x1xf32>
    %201 = tpu.concatenate %199, %200 in 0 : vector<2x1xf32>, vector<2x1xf32> -> vector<4x1xf32>
    %202 = vector.broadcast %201 : vector<4x1xf32> to vector<4x128xf32>
    %203 = arith.mulf %202, %0 : vector<4x128xf32>
    %204 = arith.addf %203, %1 : vector<4x128xf32>
    %205 = arith.truncf %198 : vector<4x64xf32> to vector<4x64xbf16>
    %cst_30 = arith.constant dense<0.000000e+00> : vector<4x128xf32>
    %206 = tpu.matmul %205, %4, %cst_30 {dimension_numbers = #tpu.dot_dimension_numbers<[1], [0], [0], [1], [0, 0, 1, 1], [], []>} : vector<4x64xbf16>, vector<64x128xbf16>, vector<4x128xf32> -> vector<4x128xf32>
    %207 = arith.addf %204, %206 : vector<4x128xf32>
    %208 = arith.negf %207 : vector<4x128xf32>
    %209 = math.exp %208 : vector<4x128xf32>
    %cst_31 = arith.constant 1.000000e+00 : f32
    %210 = vector.broadcast %cst_31 : f32 to vector<4x128xf32>
    %211 = arith.addf %210, %209 : vector<4x128xf32>
    %212 = arith.divf %210, %211 : vector<4x128xf32>
    %213 = math.tanh %207 : vector<4x128xf32>
    %214 = vector.extract_strided_slice %212 {offsets = [0, 0], sizes = [4, 32], strides = [1, 1]} : vector<4x128xf32> to vector<4x32xf32>
    %215 = vector.extract_strided_slice %212 {offsets = [0, 32], sizes = [4, 32], strides = [1, 1]} : vector<4x128xf32> to vector<4x32xf32>
    %216 = vector.extract_strided_slice %213 {offsets = [0, 64], sizes = [4, 32], strides = [1, 1]} : vector<4x128xf32> to vector<4x32xf32>
    %217 = vector.extract_strided_slice %212 {offsets = [0, 96], sizes = [4, 32], strides = [1, 1]} : vector<4x128xf32> to vector<4x32xf32>
    %218 = arith.mulf %215, %193 : vector<4x32xf32>
    %219 = arith.mulf %214, %216 : vector<4x32xf32>
    %220 = arith.addf %218, %219 : vector<4x32xf32>
    %221 = math.tanh %220 : vector<4x32xf32>
    %222 = arith.mulf %217, %221 : vector<4x32xf32>
    %223 = tpu.concatenate %222, %222 in 1 : vector<4x32xf32>, vector<4x32xf32> -> vector<4x64xf32>
    %cst_32 = arith.constant 0.000000e+00 : f32
    %224 = vector.broadcast %cst_32 : f32 to vector<4x64xf32>
    %225 = arith.select %61, %223, %224 : vector<4x64xi1>, vector<4x64xf32>
    %226 = vector.extract_strided_slice %53 {offsets = [0, 6], sizes = [2, 1], strides = [1, 1]} : vector<2x8xf32> to vector<2x1xf32>
    %227 = vector.extract_strided_slice %53 {offsets = [0, 1], sizes = [2, 1], strides = [1, 1]} : vector<2x8xf32> to vector<2x1xf32>
    %228 = tpu.concatenate %226, %227 in 0 : vector<2x1xf32>, vector<2x1xf32> -> vector<4x1xf32>
    %229 = vector.broadcast %228 : vector<4x1xf32> to vector<4x128xf32>
    %230 = arith.mulf %229, %0 : vector<4x128xf32>
    %231 = arith.addf %230, %1 : vector<4x128xf32>
    %232 = arith.truncf %225 : vector<4x64xf32> to vector<4x64xbf16>
    %cst_33 = arith.constant dense<0.000000e+00> : vector<4x128xf32>
    %233 = tpu.matmul %232, %4, %cst_33 {dimension_numbers = #tpu.dot_dimension_numbers<[1], [0], [0], [1], [0, 0, 1, 1], [], []>} : vector<4x64xbf16>, vector<64x128xbf16>, vector<4x128xf32> -> vector<4x128xf32>
    %234 = arith.addf %231, %233 : vector<4x128xf32>
    %235 = arith.negf %234 : vector<4x128xf32>
    %236 = math.exp %235 : vector<4x128xf32>
    %cst_34 = arith.constant 1.000000e+00 : f32
    %237 = vector.broadcast %cst_34 : f32 to vector<4x128xf32>
    %238 = arith.addf %237, %236 : vector<4x128xf32>
    %239 = arith.divf %237, %238 : vector<4x128xf32>
    %240 = math.tanh %234 : vector<4x128xf32>
    %241 = vector.extract_strided_slice %239 {offsets = [0, 0], sizes = [4, 32], strides = [1, 1]} : vector<4x128xf32> to vector<4x32xf32>
    %242 = vector.extract_strided_slice %239 {offsets = [0, 32], sizes = [4, 32], strides = [1, 1]} : vector<4x128xf32> to vector<4x32xf32>
    %243 = vector.extract_strided_slice %240 {offsets = [0, 64], sizes = [4, 32], strides = [1, 1]} : vector<4x128xf32> to vector<4x32xf32>
    %244 = vector.extract_strided_slice %239 {offsets = [0, 96], sizes = [4, 32], strides = [1, 1]} : vector<4x128xf32> to vector<4x32xf32>
    %245 = arith.mulf %242, %220 : vector<4x32xf32>
    %246 = arith.mulf %241, %243 : vector<4x32xf32>
    %247 = arith.addf %245, %246 : vector<4x32xf32>
    %248 = math.tanh %247 : vector<4x32xf32>
    %249 = arith.mulf %244, %248 : vector<4x32xf32>
    %250 = tpu.concatenate %249, %249 in 1 : vector<4x32xf32>, vector<4x32xf32> -> vector<4x64xf32>
    %cst_35 = arith.constant 0.000000e+00 : f32
    %251 = vector.broadcast %cst_35 : f32 to vector<4x64xf32>
    %252 = arith.select %61, %250, %251 : vector<4x64xi1>, vector<4x64xf32>
    %253 = vector.extract_strided_slice %53 {offsets = [0, 7], sizes = [2, 1], strides = [1, 1]} : vector<2x8xf32> to vector<2x1xf32>
    %254 = vector.extract_strided_slice %53 {offsets = [0, 0], sizes = [2, 1], strides = [1, 1]} : vector<2x8xf32> to vector<2x1xf32>
    %255 = tpu.concatenate %253, %254 in 0 : vector<2x1xf32>, vector<2x1xf32> -> vector<4x1xf32>
    %256 = vector.broadcast %255 : vector<4x1xf32> to vector<4x128xf32>
    %257 = arith.mulf %256, %0 : vector<4x128xf32>
    %258 = arith.addf %257, %1 : vector<4x128xf32>
    %259 = arith.truncf %252 : vector<4x64xf32> to vector<4x64xbf16>
    %cst_36 = arith.constant dense<0.000000e+00> : vector<4x128xf32>
    %260 = tpu.matmul %259, %4, %cst_36 {dimension_numbers = #tpu.dot_dimension_numbers<[1], [0], [0], [1], [0, 0, 1, 1], [], []>} : vector<4x64xbf16>, vector<64x128xbf16>, vector<4x128xf32> -> vector<4x128xf32>
    %261 = arith.addf %258, %260 : vector<4x128xf32>
    %262 = arith.negf %261 : vector<4x128xf32>
    %263 = math.exp %262 : vector<4x128xf32>
    %cst_37 = arith.constant 1.000000e+00 : f32
    %264 = vector.broadcast %cst_37 : f32 to vector<4x128xf32>
    %265 = arith.addf %264, %263 : vector<4x128xf32>
    %266 = arith.divf %264, %265 : vector<4x128xf32>
    %267 = math.tanh %261 : vector<4x128xf32>
    %268 = vector.extract_strided_slice %266 {offsets = [0, 0], sizes = [4, 32], strides = [1, 1]} : vector<4x128xf32> to vector<4x32xf32>
    %269 = vector.extract_strided_slice %266 {offsets = [0, 32], sizes = [4, 32], strides = [1, 1]} : vector<4x128xf32> to vector<4x32xf32>
    %270 = vector.extract_strided_slice %267 {offsets = [0, 64], sizes = [4, 32], strides = [1, 1]} : vector<4x128xf32> to vector<4x32xf32>
    %271 = vector.extract_strided_slice %266 {offsets = [0, 96], sizes = [4, 32], strides = [1, 1]} : vector<4x128xf32> to vector<4x32xf32>
    %272 = arith.mulf %269, %247 : vector<4x32xf32>
    %273 = arith.mulf %268, %270 : vector<4x32xf32>
    %274 = arith.addf %272, %273 : vector<4x32xf32>
    %275 = math.tanh %274 : vector<4x32xf32>
    %276 = arith.mulf %271, %275 : vector<4x32xf32>
    %277 = vector.extract_strided_slice %87 {offsets = [0, 0], sizes = [2, 32], strides = [1, 1]} : vector<4x32xf32> to vector<2x32xf32>
    %278 = vector.extract_strided_slice %114 {offsets = [0, 0], sizes = [2, 32], strides = [1, 1]} : vector<4x32xf32> to vector<2x32xf32>
    %279 = vector.extract_strided_slice %141 {offsets = [0, 0], sizes = [2, 32], strides = [1, 1]} : vector<4x32xf32> to vector<2x32xf32>
    %280 = vector.extract_strided_slice %168 {offsets = [0, 0], sizes = [2, 32], strides = [1, 1]} : vector<4x32xf32> to vector<2x32xf32>
    %281 = vector.extract_strided_slice %195 {offsets = [0, 0], sizes = [2, 32], strides = [1, 1]} : vector<4x32xf32> to vector<2x32xf32>
    %282 = vector.extract_strided_slice %222 {offsets = [0, 0], sizes = [2, 32], strides = [1, 1]} : vector<4x32xf32> to vector<2x32xf32>
    %283 = vector.extract_strided_slice %249 {offsets = [0, 0], sizes = [2, 32], strides = [1, 1]} : vector<4x32xf32> to vector<2x32xf32>
    %284 = vector.extract_strided_slice %276 {offsets = [0, 0], sizes = [2, 32], strides = [1, 1]} : vector<4x32xf32> to vector<2x32xf32>
    %285 = tpu.concatenate %277, %278, %279, %280, %281, %282, %283, %284 in 0 : vector<2x32xf32>, vector<2x32xf32>, vector<2x32xf32>, vector<2x32xf32>, vector<2x32xf32>, vector<2x32xf32>, vector<2x32xf32>, vector<2x32xf32> -> vector<16x32xf32>
    %286 = vector.extract_strided_slice %276 {offsets = [2, 0], sizes = [2, 32], strides = [1, 1]} : vector<4x32xf32> to vector<2x32xf32>
    %287 = vector.extract_strided_slice %249 {offsets = [2, 0], sizes = [2, 32], strides = [1, 1]} : vector<4x32xf32> to vector<2x32xf32>
    %288 = vector.extract_strided_slice %222 {offsets = [2, 0], sizes = [2, 32], strides = [1, 1]} : vector<4x32xf32> to vector<2x32xf32>
    %289 = vector.extract_strided_slice %195 {offsets = [2, 0], sizes = [2, 32], strides = [1, 1]} : vector<4x32xf32> to vector<2x32xf32>
    %290 = vector.extract_strided_slice %168 {offsets = [2, 0], sizes = [2, 32], strides = [1, 1]} : vector<4x32xf32> to vector<2x32xf32>
    %291 = vector.extract_strided_slice %141 {offsets = [2, 0], sizes = [2, 32], strides = [1, 1]} : vector<4x32xf32> to vector<2x32xf32>
    %292 = vector.extract_strided_slice %114 {offsets = [2, 0], sizes = [2, 32], strides = [1, 1]} : vector<4x32xf32> to vector<2x32xf32>
    %293 = vector.extract_strided_slice %87 {offsets = [2, 0], sizes = [2, 32], strides = [1, 1]} : vector<4x32xf32> to vector<2x32xf32>
    %294 = tpu.concatenate %286, %287, %288, %289, %290, %291, %292, %293 in 0 : vector<2x32xf32>, vector<2x32xf32>, vector<2x32xf32>, vector<2x32xf32>, vector<2x32xf32>, vector<2x32xf32>, vector<2x32xf32>, vector<2x32xf32> -> vector<16x32xf32>
    %295 = tpu.concatenate %285, %294 in 1 : vector<16x32xf32>, vector<16x32xf32> -> vector<16x64xf32>
    %296 = arith.truncf %295 : vector<16x64xf32> to vector<16x64xbf16>
    %cst_38 = arith.constant dense<0.000000e+00> : vector<16x128xf32>
    %297 = tpu.matmul %296, %5, %cst_38 {dimension_numbers = #tpu.dot_dimension_numbers<[1], [0], [0], [1], [0, 0, 1, 1], [], []>} : vector<16x64xbf16>, vector<64x128xbf16>, vector<16x128xf32> -> vector<16x128xf32>
    %cst_39 = arith.constant dense<0.000000e+00> : vector<16x128xf32>
    %298 = tpu.matmul %296, %6, %cst_39 {dimension_numbers = #tpu.dot_dimension_numbers<[1], [0], [0], [1], [0, 0, 1, 1], [], []>} : vector<16x64xbf16>, vector<64x128xbf16>, vector<16x128xf32> -> vector<16x128xf32>
    %cst_40 = arith.constant 0.000000e+00 : f32
    %299 = vector.broadcast %cst_40 : f32 to vector<4x64xf32>
    %cst_41 = arith.constant 0.000000e+00 : f32
    %300 = vector.broadcast %cst_41 : f32 to vector<4x32xf32>
    %301 = vector.extract_strided_slice %297 {offsets = [0, 0], sizes = [2, 128], strides = [1, 1]} : vector<16x128xf32> to vector<2x128xf32>
    %302 = vector.extract_strided_slice %298 {offsets = [14, 0], sizes = [2, 128], strides = [1, 1]} : vector<16x128xf32> to vector<2x128xf32>
    %303 = tpu.concatenate %301, %302 in 0 : vector<2x128xf32>, vector<2x128xf32> -> vector<4x128xf32>
    %304 = arith.addf %303, %2 : vector<4x128xf32>
    %305 = arith.truncf %299 : vector<4x64xf32> to vector<4x64xbf16>
    %cst_42 = arith.constant dense<0.000000e+00> : vector<4x128xf32>
    %306 = tpu.matmul %305, %7, %cst_42 {dimension_numbers = #tpu.dot_dimension_numbers<[1], [0], [0], [1], [0, 0, 1, 1], [], []>} : vector<4x64xbf16>, vector<64x128xbf16>, vector<4x128xf32> -> vector<4x128xf32>
    %307 = arith.addf %304, %306 : vector<4x128xf32>
    %308 = arith.negf %307 : vector<4x128xf32>
    %309 = math.exp %308 : vector<4x128xf32>
    %cst_43 = arith.constant 1.000000e+00 : f32
    %310 = vector.broadcast %cst_43 : f32 to vector<4x128xf32>
    %311 = arith.addf %310, %309 : vector<4x128xf32>
    %312 = arith.divf %310, %311 : vector<4x128xf32>
    %313 = math.tanh %307 : vector<4x128xf32>
    %314 = vector.extract_strided_slice %312 {offsets = [0, 0], sizes = [4, 32], strides = [1, 1]} : vector<4x128xf32> to vector<4x32xf32>
    %315 = vector.extract_strided_slice %312 {offsets = [0, 32], sizes = [4, 32], strides = [1, 1]} : vector<4x128xf32> to vector<4x32xf32>
    %316 = vector.extract_strided_slice %313 {offsets = [0, 64], sizes = [4, 32], strides = [1, 1]} : vector<4x128xf32> to vector<4x32xf32>
    %317 = vector.extract_strided_slice %312 {offsets = [0, 96], sizes = [4, 32], strides = [1, 1]} : vector<4x128xf32> to vector<4x32xf32>
    %318 = arith.mulf %315, %300 : vector<4x32xf32>
    %319 = arith.mulf %314, %316 : vector<4x32xf32>
    %320 = arith.addf %318, %319 : vector<4x32xf32>
    %321 = math.tanh %320 : vector<4x32xf32>
    %322 = arith.mulf %317, %321 : vector<4x32xf32>
    %323 = tpu.concatenate %322, %322 in 1 : vector<4x32xf32>, vector<4x32xf32> -> vector<4x64xf32>
    %cst_44 = arith.constant 0.000000e+00 : f32
    %324 = vector.broadcast %cst_44 : f32 to vector<4x64xf32>
    %325 = arith.select %61, %323, %324 : vector<4x64xi1>, vector<4x64xf32>
    %326 = vector.extract_strided_slice %297 {offsets = [2, 0], sizes = [2, 128], strides = [1, 1]} : vector<16x128xf32> to vector<2x128xf32>
    %327 = vector.extract_strided_slice %298 {offsets = [12, 0], sizes = [2, 128], strides = [1, 1]} : vector<16x128xf32> to vector<2x128xf32>
    %328 = tpu.concatenate %326, %327 in 0 : vector<2x128xf32>, vector<2x128xf32> -> vector<4x128xf32>
    %329 = arith.addf %328, %2 : vector<4x128xf32>
    %330 = arith.truncf %325 : vector<4x64xf32> to vector<4x64xbf16>
    %cst_45 = arith.constant dense<0.000000e+00> : vector<4x128xf32>
    %331 = tpu.matmul %330, %7, %cst_45 {dimension_numbers = #tpu.dot_dimension_numbers<[1], [0], [0], [1], [0, 0, 1, 1], [], []>} : vector<4x64xbf16>, vector<64x128xbf16>, vector<4x128xf32> -> vector<4x128xf32>
    %332 = arith.addf %329, %331 : vector<4x128xf32>
    %333 = arith.negf %332 : vector<4x128xf32>
    %334 = math.exp %333 : vector<4x128xf32>
    %cst_46 = arith.constant 1.000000e+00 : f32
    %335 = vector.broadcast %cst_46 : f32 to vector<4x128xf32>
    %336 = arith.addf %335, %334 : vector<4x128xf32>
    %337 = arith.divf %335, %336 : vector<4x128xf32>
    %338 = math.tanh %332 : vector<4x128xf32>
    %339 = vector.extract_strided_slice %337 {offsets = [0, 0], sizes = [4, 32], strides = [1, 1]} : vector<4x128xf32> to vector<4x32xf32>
    %340 = vector.extract_strided_slice %337 {offsets = [0, 32], sizes = [4, 32], strides = [1, 1]} : vector<4x128xf32> to vector<4x32xf32>
    %341 = vector.extract_strided_slice %338 {offsets = [0, 64], sizes = [4, 32], strides = [1, 1]} : vector<4x128xf32> to vector<4x32xf32>
    %342 = vector.extract_strided_slice %337 {offsets = [0, 96], sizes = [4, 32], strides = [1, 1]} : vector<4x128xf32> to vector<4x32xf32>
    %343 = arith.mulf %340, %320 : vector<4x32xf32>
    %344 = arith.mulf %339, %341 : vector<4x32xf32>
    %345 = arith.addf %343, %344 : vector<4x32xf32>
    %346 = math.tanh %345 : vector<4x32xf32>
    %347 = arith.mulf %342, %346 : vector<4x32xf32>
    %348 = tpu.concatenate %347, %347 in 1 : vector<4x32xf32>, vector<4x32xf32> -> vector<4x64xf32>
    %cst_47 = arith.constant 0.000000e+00 : f32
    %349 = vector.broadcast %cst_47 : f32 to vector<4x64xf32>
    %350 = arith.select %61, %348, %349 : vector<4x64xi1>, vector<4x64xf32>
    %351 = vector.extract_strided_slice %297 {offsets = [4, 0], sizes = [2, 128], strides = [1, 1]} : vector<16x128xf32> to vector<2x128xf32>
    %352 = vector.extract_strided_slice %298 {offsets = [10, 0], sizes = [2, 128], strides = [1, 1]} : vector<16x128xf32> to vector<2x128xf32>
    %353 = tpu.concatenate %351, %352 in 0 : vector<2x128xf32>, vector<2x128xf32> -> vector<4x128xf32>
    %354 = arith.addf %353, %2 : vector<4x128xf32>
    %355 = arith.truncf %350 : vector<4x64xf32> to vector<4x64xbf16>
    %cst_48 = arith.constant dense<0.000000e+00> : vector<4x128xf32>
    %356 = tpu.matmul %355, %7, %cst_48 {dimension_numbers = #tpu.dot_dimension_numbers<[1], [0], [0], [1], [0, 0, 1, 1], [], []>} : vector<4x64xbf16>, vector<64x128xbf16>, vector<4x128xf32> -> vector<4x128xf32>
    %357 = arith.addf %354, %356 : vector<4x128xf32>
    %358 = arith.negf %357 : vector<4x128xf32>
    %359 = math.exp %358 : vector<4x128xf32>
    %cst_49 = arith.constant 1.000000e+00 : f32
    %360 = vector.broadcast %cst_49 : f32 to vector<4x128xf32>
    %361 = arith.addf %360, %359 : vector<4x128xf32>
    %362 = arith.divf %360, %361 : vector<4x128xf32>
    %363 = math.tanh %357 : vector<4x128xf32>
    %364 = vector.extract_strided_slice %362 {offsets = [0, 0], sizes = [4, 32], strides = [1, 1]} : vector<4x128xf32> to vector<4x32xf32>
    %365 = vector.extract_strided_slice %362 {offsets = [0, 32], sizes = [4, 32], strides = [1, 1]} : vector<4x128xf32> to vector<4x32xf32>
    %366 = vector.extract_strided_slice %363 {offsets = [0, 64], sizes = [4, 32], strides = [1, 1]} : vector<4x128xf32> to vector<4x32xf32>
    %367 = vector.extract_strided_slice %362 {offsets = [0, 96], sizes = [4, 32], strides = [1, 1]} : vector<4x128xf32> to vector<4x32xf32>
    %368 = arith.mulf %365, %345 : vector<4x32xf32>
    %369 = arith.mulf %364, %366 : vector<4x32xf32>
    %370 = arith.addf %368, %369 : vector<4x32xf32>
    %371 = math.tanh %370 : vector<4x32xf32>
    %372 = arith.mulf %367, %371 : vector<4x32xf32>
    %373 = tpu.concatenate %372, %372 in 1 : vector<4x32xf32>, vector<4x32xf32> -> vector<4x64xf32>
    %cst_50 = arith.constant 0.000000e+00 : f32
    %374 = vector.broadcast %cst_50 : f32 to vector<4x64xf32>
    %375 = arith.select %61, %373, %374 : vector<4x64xi1>, vector<4x64xf32>
    %376 = vector.extract_strided_slice %297 {offsets = [6, 0], sizes = [2, 128], strides = [1, 1]} : vector<16x128xf32> to vector<2x128xf32>
    %377 = vector.extract_strided_slice %298 {offsets = [8, 0], sizes = [2, 128], strides = [1, 1]} : vector<16x128xf32> to vector<2x128xf32>
    %378 = tpu.concatenate %376, %377 in 0 : vector<2x128xf32>, vector<2x128xf32> -> vector<4x128xf32>
    %379 = arith.addf %378, %2 : vector<4x128xf32>
    %380 = arith.truncf %375 : vector<4x64xf32> to vector<4x64xbf16>
    %cst_51 = arith.constant dense<0.000000e+00> : vector<4x128xf32>
    %381 = tpu.matmul %380, %7, %cst_51 {dimension_numbers = #tpu.dot_dimension_numbers<[1], [0], [0], [1], [0, 0, 1, 1], [], []>} : vector<4x64xbf16>, vector<64x128xbf16>, vector<4x128xf32> -> vector<4x128xf32>
    %382 = arith.addf %379, %381 : vector<4x128xf32>
    %383 = arith.negf %382 : vector<4x128xf32>
    %384 = math.exp %383 : vector<4x128xf32>
    %cst_52 = arith.constant 1.000000e+00 : f32
    %385 = vector.broadcast %cst_52 : f32 to vector<4x128xf32>
    %386 = arith.addf %385, %384 : vector<4x128xf32>
    %387 = arith.divf %385, %386 : vector<4x128xf32>
    %388 = math.tanh %382 : vector<4x128xf32>
    %389 = vector.extract_strided_slice %387 {offsets = [0, 0], sizes = [4, 32], strides = [1, 1]} : vector<4x128xf32> to vector<4x32xf32>
    %390 = vector.extract_strided_slice %387 {offsets = [0, 32], sizes = [4, 32], strides = [1, 1]} : vector<4x128xf32> to vector<4x32xf32>
    %391 = vector.extract_strided_slice %388 {offsets = [0, 64], sizes = [4, 32], strides = [1, 1]} : vector<4x128xf32> to vector<4x32xf32>
    %392 = vector.extract_strided_slice %387 {offsets = [0, 96], sizes = [4, 32], strides = [1, 1]} : vector<4x128xf32> to vector<4x32xf32>
    %393 = arith.mulf %390, %370 : vector<4x32xf32>
    %394 = arith.mulf %389, %391 : vector<4x32xf32>
    %395 = arith.addf %393, %394 : vector<4x32xf32>
    %396 = math.tanh %395 : vector<4x32xf32>
    %397 = arith.mulf %392, %396 : vector<4x32xf32>
    %398 = tpu.concatenate %397, %397 in 1 : vector<4x32xf32>, vector<4x32xf32> -> vector<4x64xf32>
    %cst_53 = arith.constant 0.000000e+00 : f32
    %399 = vector.broadcast %cst_53 : f32 to vector<4x64xf32>
    %400 = arith.select %61, %398, %399 : vector<4x64xi1>, vector<4x64xf32>
    %401 = vector.extract_strided_slice %297 {offsets = [8, 0], sizes = [2, 128], strides = [1, 1]} : vector<16x128xf32> to vector<2x128xf32>
    %402 = vector.extract_strided_slice %298 {offsets = [6, 0], sizes = [2, 128], strides = [1, 1]} : vector<16x128xf32> to vector<2x128xf32>
    %403 = tpu.concatenate %401, %402 in 0 : vector<2x128xf32>, vector<2x128xf32> -> vector<4x128xf32>
    %404 = arith.addf %403, %2 : vector<4x128xf32>
    %405 = arith.truncf %400 : vector<4x64xf32> to vector<4x64xbf16>
    %cst_54 = arith.constant dense<0.000000e+00> : vector<4x128xf32>
    %406 = tpu.matmul %405, %7, %cst_54 {dimension_numbers = #tpu.dot_dimension_numbers<[1], [0], [0], [1], [0, 0, 1, 1], [], []>} : vector<4x64xbf16>, vector<64x128xbf16>, vector<4x128xf32> -> vector<4x128xf32>
    %407 = arith.addf %404, %406 : vector<4x128xf32>
    %408 = arith.negf %407 : vector<4x128xf32>
    %409 = math.exp %408 : vector<4x128xf32>
    %cst_55 = arith.constant 1.000000e+00 : f32
    %410 = vector.broadcast %cst_55 : f32 to vector<4x128xf32>
    %411 = arith.addf %410, %409 : vector<4x128xf32>
    %412 = arith.divf %410, %411 : vector<4x128xf32>
    %413 = math.tanh %407 : vector<4x128xf32>
    %414 = vector.extract_strided_slice %412 {offsets = [0, 0], sizes = [4, 32], strides = [1, 1]} : vector<4x128xf32> to vector<4x32xf32>
    %415 = vector.extract_strided_slice %412 {offsets = [0, 32], sizes = [4, 32], strides = [1, 1]} : vector<4x128xf32> to vector<4x32xf32>
    %416 = vector.extract_strided_slice %413 {offsets = [0, 64], sizes = [4, 32], strides = [1, 1]} : vector<4x128xf32> to vector<4x32xf32>
    %417 = vector.extract_strided_slice %412 {offsets = [0, 96], sizes = [4, 32], strides = [1, 1]} : vector<4x128xf32> to vector<4x32xf32>
    %418 = arith.mulf %415, %395 : vector<4x32xf32>
    %419 = arith.mulf %414, %416 : vector<4x32xf32>
    %420 = arith.addf %418, %419 : vector<4x32xf32>
    %421 = math.tanh %420 : vector<4x32xf32>
    %422 = arith.mulf %417, %421 : vector<4x32xf32>
    %423 = tpu.concatenate %422, %422 in 1 : vector<4x32xf32>, vector<4x32xf32> -> vector<4x64xf32>
    %cst_56 = arith.constant 0.000000e+00 : f32
    %424 = vector.broadcast %cst_56 : f32 to vector<4x64xf32>
    %425 = arith.select %61, %423, %424 : vector<4x64xi1>, vector<4x64xf32>
    %426 = vector.extract_strided_slice %297 {offsets = [10, 0], sizes = [2, 128], strides = [1, 1]} : vector<16x128xf32> to vector<2x128xf32>
    %427 = vector.extract_strided_slice %298 {offsets = [4, 0], sizes = [2, 128], strides = [1, 1]} : vector<16x128xf32> to vector<2x128xf32>
    %428 = tpu.concatenate %426, %427 in 0 : vector<2x128xf32>, vector<2x128xf32> -> vector<4x128xf32>
    %429 = arith.addf %428, %2 : vector<4x128xf32>
    %430 = arith.truncf %425 : vector<4x64xf32> to vector<4x64xbf16>
    %cst_57 = arith.constant dense<0.000000e+00> : vector<4x128xf32>
    %431 = tpu.matmul %430, %7, %cst_57 {dimension_numbers = #tpu.dot_dimension_numbers<[1], [0], [0], [1], [0, 0, 1, 1], [], []>} : vector<4x64xbf16>, vector<64x128xbf16>, vector<4x128xf32> -> vector<4x128xf32>
    %432 = arith.addf %429, %431 : vector<4x128xf32>
    %433 = arith.negf %432 : vector<4x128xf32>
    %434 = math.exp %433 : vector<4x128xf32>
    %cst_58 = arith.constant 1.000000e+00 : f32
    %435 = vector.broadcast %cst_58 : f32 to vector<4x128xf32>
    %436 = arith.addf %435, %434 : vector<4x128xf32>
    %437 = arith.divf %435, %436 : vector<4x128xf32>
    %438 = math.tanh %432 : vector<4x128xf32>
    %439 = vector.extract_strided_slice %437 {offsets = [0, 0], sizes = [4, 32], strides = [1, 1]} : vector<4x128xf32> to vector<4x32xf32>
    %440 = vector.extract_strided_slice %437 {offsets = [0, 32], sizes = [4, 32], strides = [1, 1]} : vector<4x128xf32> to vector<4x32xf32>
    %441 = vector.extract_strided_slice %438 {offsets = [0, 64], sizes = [4, 32], strides = [1, 1]} : vector<4x128xf32> to vector<4x32xf32>
    %442 = vector.extract_strided_slice %437 {offsets = [0, 96], sizes = [4, 32], strides = [1, 1]} : vector<4x128xf32> to vector<4x32xf32>
    %443 = arith.mulf %440, %420 : vector<4x32xf32>
    %444 = arith.mulf %439, %441 : vector<4x32xf32>
    %445 = arith.addf %443, %444 : vector<4x32xf32>
    %446 = math.tanh %445 : vector<4x32xf32>
    %447 = arith.mulf %442, %446 : vector<4x32xf32>
    %448 = tpu.concatenate %447, %447 in 1 : vector<4x32xf32>, vector<4x32xf32> -> vector<4x64xf32>
    %cst_59 = arith.constant 0.000000e+00 : f32
    %449 = vector.broadcast %cst_59 : f32 to vector<4x64xf32>
    %450 = arith.select %61, %448, %449 : vector<4x64xi1>, vector<4x64xf32>
    %451 = vector.extract_strided_slice %297 {offsets = [12, 0], sizes = [2, 128], strides = [1, 1]} : vector<16x128xf32> to vector<2x128xf32>
    %452 = vector.extract_strided_slice %298 {offsets = [2, 0], sizes = [2, 128], strides = [1, 1]} : vector<16x128xf32> to vector<2x128xf32>
    %453 = tpu.concatenate %451, %452 in 0 : vector<2x128xf32>, vector<2x128xf32> -> vector<4x128xf32>
    %454 = arith.addf %453, %2 : vector<4x128xf32>
    %455 = arith.truncf %450 : vector<4x64xf32> to vector<4x64xbf16>
    %cst_60 = arith.constant dense<0.000000e+00> : vector<4x128xf32>
    %456 = tpu.matmul %455, %7, %cst_60 {dimension_numbers = #tpu.dot_dimension_numbers<[1], [0], [0], [1], [0, 0, 1, 1], [], []>} : vector<4x64xbf16>, vector<64x128xbf16>, vector<4x128xf32> -> vector<4x128xf32>
    %457 = arith.addf %454, %456 : vector<4x128xf32>
    %458 = arith.negf %457 : vector<4x128xf32>
    %459 = math.exp %458 : vector<4x128xf32>
    %cst_61 = arith.constant 1.000000e+00 : f32
    %460 = vector.broadcast %cst_61 : f32 to vector<4x128xf32>
    %461 = arith.addf %460, %459 : vector<4x128xf32>
    %462 = arith.divf %460, %461 : vector<4x128xf32>
    %463 = math.tanh %457 : vector<4x128xf32>
    %464 = vector.extract_strided_slice %462 {offsets = [0, 0], sizes = [4, 32], strides = [1, 1]} : vector<4x128xf32> to vector<4x32xf32>
    %465 = vector.extract_strided_slice %462 {offsets = [0, 32], sizes = [4, 32], strides = [1, 1]} : vector<4x128xf32> to vector<4x32xf32>
    %466 = vector.extract_strided_slice %463 {offsets = [0, 64], sizes = [4, 32], strides = [1, 1]} : vector<4x128xf32> to vector<4x32xf32>
    %467 = vector.extract_strided_slice %462 {offsets = [0, 96], sizes = [4, 32], strides = [1, 1]} : vector<4x128xf32> to vector<4x32xf32>
    %468 = arith.mulf %465, %445 : vector<4x32xf32>
    %469 = arith.mulf %464, %466 : vector<4x32xf32>
    %470 = arith.addf %468, %469 : vector<4x32xf32>
    %471 = math.tanh %470 : vector<4x32xf32>
    %472 = arith.mulf %467, %471 : vector<4x32xf32>
    %473 = tpu.concatenate %472, %472 in 1 : vector<4x32xf32>, vector<4x32xf32> -> vector<4x64xf32>
    %cst_62 = arith.constant 0.000000e+00 : f32
    %474 = vector.broadcast %cst_62 : f32 to vector<4x64xf32>
    %475 = arith.select %61, %473, %474 : vector<4x64xi1>, vector<4x64xf32>
    %476 = vector.extract_strided_slice %297 {offsets = [14, 0], sizes = [2, 128], strides = [1, 1]} : vector<16x128xf32> to vector<2x128xf32>
    %477 = vector.extract_strided_slice %298 {offsets = [0, 0], sizes = [2, 128], strides = [1, 1]} : vector<16x128xf32> to vector<2x128xf32>
    %478 = tpu.concatenate %476, %477 in 0 : vector<2x128xf32>, vector<2x128xf32> -> vector<4x128xf32>
    %479 = arith.addf %478, %2 : vector<4x128xf32>
    %480 = arith.truncf %475 : vector<4x64xf32> to vector<4x64xbf16>
    %cst_63 = arith.constant dense<0.000000e+00> : vector<4x128xf32>
    %481 = tpu.matmul %480, %7, %cst_63 {dimension_numbers = #tpu.dot_dimension_numbers<[1], [0], [0], [1], [0, 0, 1, 1], [], []>} : vector<4x64xbf16>, vector<64x128xbf16>, vector<4x128xf32> -> vector<4x128xf32>
    %482 = arith.addf %479, %481 : vector<4x128xf32>
    %483 = arith.negf %482 : vector<4x128xf32>
    %484 = math.exp %483 : vector<4x128xf32>
    %cst_64 = arith.constant 1.000000e+00 : f32
    %485 = vector.broadcast %cst_64 : f32 to vector<4x128xf32>
    %486 = arith.addf %485, %484 : vector<4x128xf32>
    %487 = arith.divf %485, %486 : vector<4x128xf32>
    %488 = math.tanh %482 : vector<4x128xf32>
    %489 = vector.extract_strided_slice %487 {offsets = [0, 0], sizes = [4, 32], strides = [1, 1]} : vector<4x128xf32> to vector<4x32xf32>
    %490 = vector.extract_strided_slice %487 {offsets = [0, 32], sizes = [4, 32], strides = [1, 1]} : vector<4x128xf32> to vector<4x32xf32>
    %491 = vector.extract_strided_slice %488 {offsets = [0, 64], sizes = [4, 32], strides = [1, 1]} : vector<4x128xf32> to vector<4x32xf32>
    %492 = vector.extract_strided_slice %487 {offsets = [0, 96], sizes = [4, 32], strides = [1, 1]} : vector<4x128xf32> to vector<4x32xf32>
    %493 = arith.mulf %490, %470 : vector<4x32xf32>
    %494 = arith.mulf %489, %491 : vector<4x32xf32>
    %495 = arith.addf %493, %494 : vector<4x32xf32>
    %496 = math.tanh %495 : vector<4x32xf32>
    %497 = arith.mulf %492, %496 : vector<4x32xf32>
    %498 = vector.extract_strided_slice %497 {offsets = [0, 0], sizes = [2, 32], strides = [1, 1]} : vector<4x32xf32> to vector<2x32xf32>
    %499 = vector.extract_strided_slice %497 {offsets = [2, 0], sizes = [2, 32], strides = [1, 1]} : vector<4x32xf32> to vector<2x32xf32>
    %500 = arith.addf %498, %499 : vector<2x32xf32>
    %cst_65 = arith.constant 5.000000e-01 : f32
    %501 = vector.broadcast %cst_65 : f32 to vector<2x32xf32>
    %502 = arith.mulf %500, %501 : vector<2x32xf32>
    %503 = arith.truncf %502 : vector<2x32xf32> to vector<2x32xbf16>
    %cst_66 = arith.constant dense<0.000000e+00> : vector<2x128xf32>
    %504 = tpu.matmul %503, %8, %cst_66 {dimension_numbers = #tpu.dot_dimension_numbers<[1], [0], [0], [1], [0, 0, 1, 1], [], []>} : vector<2x32xbf16>, vector<32x128xbf16>, vector<2x128xf32> -> vector<2x128xf32>
    %505 = vector.broadcast %3 : vector<1x128xf32> to vector<2x128xf32>
    %506 = arith.addf %504, %505 : vector<2x128xf32>
    %c0_67 = arith.constant 0 : index
    %c0_68 = arith.constant 0 : index
    %507 = vector.load %arg4[%c0_67, %c0_68] : memref<2x128xf32, #tpu.memory_space<vmem>>, vector<2x128xf32>
    tpu.vector_store %arg4[%c0_67, %c0_68], %506 {strides = array<i32>} : memref<2x128xf32, #tpu.memory_space<vmem>>, vector<2x128xf32>,
    return
  }
}

</mosaic_0001>

<bundles_post_ra>
// kernel: lstm_model_forward.1
= control target key start
LH: loop header
LB: loop body
LE: loop exit
PB: predicated region body
PF: predicated region fallthrough
CT: control target
= control target key end

     0   :  { %9 = vsyncpa [#allocation3], 0  ;;  %s3073_s0 = inlined_call_operand.hbm [shape: f32[2,8], index: 0, kind: input, shape index: {}]   ;;  %s3074_s1 = inlined_call_operand.vmem [shape: f32[8], index: 1, kind: input, shape index: {}]   ;;  %s3075_s2 = inlined_call_operand.hbm [shape: f32[32,128], index: 2, kind: input, shape index: {}]   ;;  %s3076_s3 = inlined_call_operand.hbm [shape: bf16[288,128], index: 3, kind: input, shape index: {}]   ;;  %s3077_s4 = inlined_call_operand.hbm [shape: f32[2,128], index: 4, kind: output, shape index: {}]  }
   0x1   :  { %10 = vsyncpa [#allocation5], 0 }
   0x2   :  { %11 = vsyncpa [#allocation8], 0 }
   0x3   :  { %12 = vsyncpa [#allocation4], 0  ;;  %s2529_s15 = smov [#allocation7]  }
   0x4   :  { %s38_s16 = sshll.u32 %s2529_s15, 4  ;;  %s39_s16 = int_to_ptr.vmem [resolvable:$true] %s38_s16 }
   0x5   :  { %s2437_s17 = scalar_lea.vmem %s39_s16, 512  ;;  %p2442_p1 = scmp.lt.s32.totalorder %s39_s16, %s39_s16 }
   0x6   :  { %p2438_p0 = scmp.ne.s32.totalorder %s39_s16, %s2437_s17  ;;  %p2443_p2 = scmp.lt.s32.totalorder %s2437_s17, %s2437_s17 }
   0x8   :  { %p2444_p3 = por %p2443_p2, %p2442_p1 }
   0xa   :  { %p2445_p4 = pnand %p2444_p3, %p2438_p0 }
   0xc   :  { %2448 = shalt.err (!%p2445_p4)
}
   0xd   :  { %s2530_s18 = smov 128   ;;  %s2531_s19 = smov 8  }
   0xe   :  { %44 = dma.hbm_to_vmem [thread:$0]  %s3075_s2, 512, %s39_s16, [#allocation8], %s2530_s18, %s2530_s18, %s2531_s19  }
   0xf   :  { %s2532_s22 = smov [#allocation2]   ;;  %s29_s26 = sshll.u32 %s3074_s1, 4  ;;  %s30_s26 = int_to_ptr.vmem [resolvable:$true] %s29_s26 }
  0x10   :  { %s19_s23 = sshll.u32 %s2532_s22, 4  ;;  %s20_s23 = int_to_ptr.vmem [resolvable:$true] %s19_s23 }
  0x11   :  { %s2457_s27 = scalar_lea.vmem %s20_s23, 32  ;;  %p2462_p6 = scmp.lt.s32.totalorder %s20_s23, %s20_s23 }
  0x12   :  { %p2458_p5 = scmp.ne.s32.totalorder %s20_s23, %s2457_s27  ;;  %p2463_p7 = scmp.lt.s32.totalorder %s2457_s27, %s2457_s27 }
  0x14   :  { %p2464_p8 = por %p2463_p7, %p2462_p6 }
  0x16   :  { %p2465_p9 = pnand %p2464_p8, %p2458_p5 }
  0x18   :  { %2468 = shalt.err (!%p2465_p9)
}
  0x19   :  { %22 = dma.hbm_to_vmem [thread:$0]  %s3073_s0, 32, %s20_s23, [#allocation3]  }
  0x1a   :  { %s2469_s2 = scalar_lea.vmem %s30_s26, 16  ;;  %p2474_p11 = scmp.lt.s32.totalorder %s30_s26, %s30_s26 }
  0x1b   :  { %p2470_p10 = scmp.ne.s32.totalorder %s30_s26, %s2469_s2  ;;  %p2475_p12 = scmp.lt.s32.totalorder %s2469_s2, %s2469_s2 }
  0x1d   :  { %p2476_p13 = por %p2475_p12, %p2474_p11 }
  0x1f   :  { %p2477_p0 = pnand %p2476_p13, %p2470_p10 }
  0x21   :  { %2480 = shalt.err (!%p2477_p0)
}
  0x22   :  { %s2533_s1 = smov [#allocation6]   ;;  %s2534_s30 = smov [#allocation9]  }
  0x23   :  { %32 = dma.vmem_to_smem %s30_s26, 16, %s2533_s1, [#allocation5]  }
  0x24   :  { %s50_s5 = sshll.u32 %s2534_s30, 4  ;;  %s51_s5 = int_to_ptr.vmem [resolvable:$true] %s50_s5 }
  0x25   :  { %s2489_s6 = scalar_lea.vmem %s51_s5, 2304  ;;  %p2494_p2 = scmp.lt.s32.totalorder %s51_s5, %s51_s5 }
  0x26   :  { %p2490_p1 = scmp.ne.s32.totalorder %s51_s5, %s2489_s6  ;;  %p2495_p3 = scmp.lt.s32.totalorder %s2489_s6, %s2489_s6 }
  0x28   :  { %p2496_p4 = por %p2495_p3, %p2494_p2 }
  0x2a   :  { %p2497_p5 = pnand %p2496_p4, %p2490_p1 }
  0x2c   :  { %2500 = shalt.err (!%p2497_p5)
}
  0x2d   :  { %s2535_s0 = smov 64   ;;  %s2536_s7 = smov 4  }
  0x2e   :  { %56 = dma.hbm_to_vmem [thread:$0]  %s3076_s3, 2304, %s51_s5, [#allocation8], %s2535_s0, %s2535_s0, %s2536_s7  }
  0x2f   :  { %2521 = dma.done.wait [#allocation3], 32  }
  0x30   :  { %2522 = vsyncadd [#allocation3], 4294967264 }
  0x31   :  { %2523 = dma.done.wait [#allocation5], 16  }
  0x32   :  { %2524 = vsyncadd [#allocation5], 4294967280 }
  0x33   :  { %2525 = dma.done.wait [#allocation8], 2816  }
  0x34   :  { %2526 = vsyncadd [#allocation8], 4294964480 }
  0x35   :  { %69 = sfence }
  0x36   :  { %s112_s10 = sld [smem:[#allocation6]]  ;;  %v132_v0 = vlaneseq  ;;  %v2537_v1 = vmov 0.0   ;;  %v2602_v3 = vld [vmem:[#allocation9 + $0x18] sm:$0xff]   ;;  %v2605_v4 = vld [vmem:[#allocation9 + $0x10] sm:$0xff]   ;;  %v2612_v11 = vld [vmem:[#allocation9 + $0x8] sm:$0xff]   ;;  %vm2538_vm0 = vmmov 0  }
  0x37   :  { %s1854_s11 = sld [smem:[#allocation6 + $0x1]]  ;;  %2006 = vmatprep.subr.bf16.mxu0 %v2537_v1  ;;  %2018 = vmatprep.subr.bf16.mxu1 %v2537_v1  ;;  %v111_v5 = vld [vmem:[#allocation2] sm:$0x3]  ;;  %v2539_v13 = vmov 0   ;;  %v2622_v16 = vld [vmem:[#allocation9] sm:$0xff]   ;;  %s2540_s17 = smov 121  }
  0x38   :  { %v2600_v2 = vshrl.u32 %v132_v0, 7  ;;  %s1856_s3 = sld [smem:[#allocation6 + $0x3]]  ;;  %2007 = vmatpush3.bf16.msra.mxu0 %v2602_v3  ;;  %2019 = vmatpush3.bf16.msra.mxu1 %v2602_v3  ;;  %vm180_vm1 = vcmask 1041408   ;;  %v2652_v53 = vld [vmem:[#allocation7] sm:$0xf]  ;;  %s2541_s18 = smov 32  }
  0x39   :  { %s1857_s12 = sld [smem:[#allocation6 + $0x4]]  ;;  %2008 = vmatprep.subr.bf16.mxu0 %v2537_v1  ;;  %2020 = vmatprep.subr.bf16.mxu1 %v2537_v1  ;;  %v2654_v55 = vld [vmem:[#allocation7 + $0x8] sm:$0xf]  ;;  %s2543_s19 = smov 123   ;;  %vm289_vm5 = vcmask 261120   ;;  %vm2544_vm6 = vmmov 1  }
  0x3a   :  { %v134_v7 = vsub.s32 0, %v2600_v2  ;;  %v139_v10 = vsub.s32 1, %v2600_v2  ;;  %2014 = vmatprep.mubr.msk.bf16.mxu0 %vm2538_vm0, %v2537_v1  ;;  %2026 = vmatprep.mubr.msk.bf16.mxu1 %vm2538_vm0, %v2537_v1  ;;  %s1855_s13 = sld [smem:[#allocation6 + $0x2]]  ;;  %vm171_vm2 = vcmp.lt.s32.totalorder %v2600_v2, 2  ;;  %vm213_vm8 = vcmask 523264   ;;  %s2546_s20 = smov 125  }
  0x3b   :  { %2259 = vset.pattern.permute.xlu0 %v2539_v13  ;;  %s1858_s14 = sld [smem:[#allocation6 + $0x5]]  ;;  %s2548_s21 = smov 127   ;;  %vm920_vm9 = vcmask 1043456   ;;  %vm922_vm10 = vcmask 1045504  }
  0x3c   :  { %v120_v6 = vstv %s112_s10  ;;  %2009 = vmatpush3.bf16.msra.mxu0 %v2605_v4  ;;  %2021 = vmatpush3.bf16.msra.mxu1 %v2605_v4  ;;  %s1859_s15 = sld [smem:[#allocation6 + $0x6]]  ;;  %s2550_s22 = smov 1  }
  0x3d   :  { %v121_v8 = vmul.f32 %v120_v6, %v111_v5  ;;  %v124_v9 = vstv %s1854_s11  ;;  %2010 = vmatprep.subr.bf16.mxu0 %v2537_v1  ;;  %2022 = vmatprep.subr.bf16.mxu1 %v2537_v1  ;;  %s1860_s16 = sld [smem:[#allocation6 + $0x7]]  ;;  %s2552_s23 = smov 3  }
  0x3e   :  { %v125_v12 = vmul.f32 %v124_v9, %v111_v5  ;;  %v122_v14 = vstv %s1856_s3  ;;  %s2554_s24 = smov 5   ;;  %s2556_s25 = smov 7  }
  0x3f   :  { %v126_v15 = vstv %s1857_s12  ;;  %v123_v17 = vadd.f32 %v122_v14, %v121_v8  ;;  %s2557_s26 = smov [#allocation10]  }
  0x40   :  { %v127_v18 = vadd.f32 %v126_v15, %v125_v12  ;;  %2011 = vmatpush3.bf16.msra.mxu0 %v2612_v11  ;;  %2023 = vmatpush3.bf16.msra.mxu1 %v2612_v11  ;;  %v128_v28 = vstv %s1855_s13  ;;  %v2542_v12 = vmov 1   ;;  %s1843_s27 = sshll.u32 %s2557_s26, 4  ;;  %s1844_s27 = int_to_ptr.vmem [resolvable:$true] %s1843_s27 }
  0x41   :  { %2012 = vmatprep.subr.bf16.mxu0 %v2537_v1  ;;  %2024 = vmatprep.subr.bf16.mxu1 %v2537_v1  ;;  %v129_v29 = vmul.f32 %v128_v28, %v111_v5  ;;  %v130_v30 = vstv %s1858_s14  ;;  %s2501_s28 = scalar_lea.vmem %s1844_s27, 32  ;;  %p2506_p7 = scmp.lt.s32.totalorder %s1844_s27, %s1844_s27 }
  0x42   :  { %v135_v19 = vrot.slane %v127_v18, %v134_v7  ;;  %v140_v20 = vrot.slane %v127_v18, %v139_v10  ;;  %v163_v41 = vstv %s1859_s15  ;;  %2260 = vset.pattern.permute.xlu1 %v2542_v12  ;;  %p2502_p6 = scmp.ne.s32.totalorder %s1844_s27, %s2501_s28  ;;  %p2507_p8 = scmp.lt.s32.totalorder %s2501_s28, %s2501_s28 }
  0x43   :  { %v131_v33 = vadd.f32 %v130_v30, %v129_v29  ;;  %v165_v43 = vstv %s1860_s16 }
  0x44   :  { %v136_v21 = vmul.f32 %v135_v19, %v123_v17  ;;  %v141_v22 = vmul.f32 %v140_v20, %v123_v17  ;;  %2013 = vmatpush3.bf16.msra.mxu0 %v2622_v16  ;;  %2025 = vmatpush3.bf16.msra.mxu1 %v2622_v16  ;;  %v170_v17 = vand.u32 127, %v132_v0  ;;  %p2508_p9 = por %p2507_p8, %p2506_p7 }
  0x45   :  { %2030 = vmatprep.subr.bf16.mxu0 %v2537_v1  ;;  %2042 = vmatprep.subr.bf16.mxu1 %v2537_v1  ;;  %v153_v35 = vrot.slane %v131_v33, %v134_v7  ;;  %v158_v36 = vrot.slane %v131_v33, %v139_v10 }
  0x46   :  { %v142_v23 = vmax.f32 %v136_v21, %v141_v22  ;;  %vm172_vm3 = vcmp.lt.s32.totalorder %v170_v17, 32  ;;  %p2509_p10 = pnand %p2508_p9, %p2502_p6 }
  0x47   :  { %2015 = vmatmul.mubr.bf16.vlgmr.msra.gmra.mxu0 %v2539_v13  ;;  %vm173_vm4 = vmxor %vm171_vm2, %vm172_vm3 }
  0x48   :  { %v143_v24 = vsub.f32 %v136_v21, %v142_v23  ;;  %v146_v25 = vsub.f32 %v141_v22, %v142_v23  ;;  %2031 = vmatpush3.bf16.msra.mxu0 %v2602_v3  ;;  %2038 = vmatprep.mubr.msk.bf16.mxu0 %vm2538_vm0, %v2537_v1  ;;  %vm2670_vm7 = vmxor %vm173_vm4, %vm2544_vm6 }
  0x49   :  { %2032 = vmatprep.subr.bf16.mxu0 %v2537_v1 }
  0x4a   :  { %v144_v26 = vmul.f32 1.442695, %v143_v24  ;;  %v147_v27 = vmul.f32 1.442695, %v146_v25 }
  0x4c   :  { %2295 = vpow2.f32 %v144_v26  ;;  %2033 = vmatpush3.bf16.msra.mxu0 %v2605_v4 }
  0x4d   :  { %2297 = vpow2.f32 %v147_v27  ;;  %2034 = vmatprep.subr.bf16.mxu0 %v2537_v1 }
  0x50   :  { %2035 = vmatpush3.bf16.msra.mxu0 %v2612_v11 }
  0x51   :  { %2036 = vmatprep.subr.bf16.mxu0 %v2537_v1 }
  0x54   :  { %2037 = vmatpush3.bf16.msra.mxu0 %v2622_v16 }
  0x55   :  { %2054 = vmatprep.subr.bf16.mxu0 %v2537_v1 }
  0x59   :  { %v2296_v31 = vpop.eup %2295 }
  0x5a   :  { %v2298_v32 = vpop.eup %2297  ;;  %v154_v37 = vmul.f32 %v2296_v31, %v153_v35 }
  0x5b   :  { %v149_v34 = vadd.f32 %v2298_v32, %v2296_v31  ;;  %v159_v38 = vmul.f32 %v2298_v32, %v158_v36 }
  0x5d   :  { %2299 = vrcp.f32 %v149_v34  ;;  %v160_v39 = vadd.f32 %v159_v38, %v154_v37 }
  0x6a   :  { %v2300_v40 = vpop.eup %2299 }
  0x6b   :  { %v162_v42 = vmul.f32 %v2300_v40, %v160_v39 }
  0x6d   :  { %v164_v44 = vmul.f32 %v163_v41, %v162_v42 }
  0x6f   :  { %v2644_v45 = vadd.f32 %v165_v43, %v164_v44  ;;  %v2545_v43 = vmov 2  }
  0x71   :  { %v2647_v46 = vrot.slane %v2644_v45, 6 }
  0x73   :  { %177 = vrot.lane.b32.xlu0 %v2647_v46, %s2540_s17 }
  0xe5   :  { %v178_v47 = vpop.permute.xlu0 %177 }
  0xe6   :  { %v181_v48 = vsel %vm180_vm1, %v2644_v45, %v178_v47 }
  0xe7   :  { %184 = vperm.xlu0 %2259, %v181_v48  }
  0xeb   :  { %2261 = vset.pattern.permute.xlu0 %v2545_v43 }
 0x107   :  { %v251_v49 = vpop.f32.mrf.mxu0 }
 0x109   :  { %v2016_v50 = vpop.f32.mrf.mxu0 }
 0x10b   :  { %v254_v51 = vpop.f32.mrf.mxu0 }
 0x10d   :  { %v2017_v52 = vpop.f32.mrf.mxu0 }
 0x162   :  { %v185_v54 = vpop.permute.xlu0 %184 }
 0x163   :  { %v187_v56 = vmul.f32 %v185_v54, %v2652_v53 }
 0x165   :  { %v188_v57 = vadd.f32 %v187_v56, %v2654_v55 }
 0x167   :  { %v257_v58 = vadd.f32 %v251_v49, %v188_v57 }
 0x169   :  { %2301 = vtanh.f32 %v257_v58  ;;  %v1865_v60 = vmul.f32 -1.442695, %v257_v58 }
 0x16b   :  { %2303 = vpow2.f32 %v1865_v60 }
 0x176   :  { %v2302_v59 = vpop.eup %2301 }
 0x177   :  { %267 = vrot.lane.b32.xlu1 %v2302_v59, %s2535_s0 }
 0x178   :  { %v2304_v61 = vpop.eup %2303 }
 0x179   :  { %v261_v62 = vadd.f32 1.0, %v2304_v61 }
 0x17b   :  { %2305 = vrcp.f32 %v261_v62 }
 0x188   :  { %v2306_v63 = vpop.eup %2305 }
 0x189   :  { %v265_v7 = vmul.f32 0.0, %v2306_v63 }
 0x1e9   :  { %v268_v5 = vpop.permute.xlu1 %267 }
 0x1ea   :  { %v270_v6 = vmul.f32 %v2306_v63, %v268_v5 }
 0x1ec   :  { %272 = vrot.lane.b32.xlu1 %v270_v6, %s2541_s18 }
 0x25e   :  { %v273_v8 = vpop.permute.xlu1 %272 }
 0x25f   :  { %v275_v9 = vadd.f32 %v273_v8, %v265_v7 }
 0x261   :  { %2307 = vtanh.f32 %v275_v9 }
 0x26e   :  { %v2308_v10 = vpop.eup %2307 }
 0x26f   :  { %278 = vrot.lane.b32.xlu1 %v2308_v10, %s2535_s0 }
 0x2e1   :  { %v279_v14 = vpop.permute.xlu1 %278 }
 0x2e2   :  { %v2661_v15 = vmul.f32 %v2306_v63, %v279_v14 }
 0x2e4   :  { %286 = vrot.lane.b32.xlu1 %v2661_v15, %s2535_s0  ;;  %283 = vrot.lane.b32.xlu0 %v2661_v15, %s2541_s18 }
 0x2e8   :  { %292 = vrot.lane.b32.xlu0 %v2647_v46, %s2543_s19 }
 0x356   :  { %v287_v19 = vpop.permute.xlu1 %286  ;;  %v284_v20 = vpop.permute.xlu0 %283 }
 0x357   :  { %v290_v21 = vsel %vm289_vm5, %v284_v20, %v287_v19 }
 0x358   :  { %v291_v22 = vsel %vm2670_vm7, %v290_v21, 0.0 }
 0x359   :  { %v303_v23 = vpack.c.bf16 %v291_v22, %v291_v22  ;;  %v2547_v22 = vmov 3  }
 0x35a   :  { %v293_v0 = vpop.permute.xlu0 %292 }
 0x35b   :  { %2027 = vmatmul.mubr.msk.bf16.vlgmr.msra.gmra.mxu1 %vm213_vm8, %v303_v23  ;;  %v295_v2 = vsel %vm180_vm1, %v2644_v45, %v293_v0 }
 0x35c   :  { %298 = vperm.xlu1 %2260, %v295_v2   ;;  %2043 = vmatpush3.bf16.msra.mxu1 %v2602_v3 }
 0x35d   :  { %2044 = vmatprep.subr.bf16.mxu1 %v2537_v1  ;;  %2050 = vmatprep.mubr.msk.bf16.mxu1 %vm2538_vm0, %v2537_v1 }
 0x360   :  { %2045 = vmatpush3.bf16.msra.mxu1 %v2605_v4 }
 0x361   :  { %2046 = vmatprep.subr.bf16.mxu1 %v2537_v1 }
 0x364   :  { %2047 = vmatpush3.bf16.msra.mxu1 %v2612_v11 }
 0x365   :  { %2048 = vmatprep.subr.bf16.mxu1 %v2537_v1 }
 0x368   :  { %2049 = vmatpush3.bf16.msra.mxu1 %v2622_v16 }
 0x369   :  { %2066 = vmatprep.subr.bf16.mxu1 %v2537_v1 }
 0x3d7   :  { %v299_v24 = vpop.permute.xlu1 %298 }
 0x3d8   :  { %v301_v25 = vmul.f32 %v299_v24, %v2652_v53 }
 0x3da   :  { %v302_v26 = vadd.f32 %v301_v25, %v2654_v55 }
 0x41b   :  { %v341_v27 = vpop.f32.mrf.mxu1 }
 0x41c   :  { %v347_v28 = vadd.f32 %v341_v27, %v302_v26 }
 0x41d   :  { %v2028_v29 = vpop.f32.mrf.mxu1 }
 0x41e   :  { %2309 = vtanh.f32 %v347_v28  ;;  %v1867_v33 = vmul.f32 -1.442695, %v347_v28 }
 0x41f   :  { %v344_v30 = vpop.f32.mrf.mxu1 }
 0x420   :  { %2311 = vpow2.f32 %v1867_v33 }
 0x421   :  { %v2029_v31 = vpop.f32.mrf.mxu1 }
 0x42b   :  { %v2310_v32 = vpop.eup %2309 }
 0x42c   :  { %357 = vrot.lane.b32.xlu0 %v2310_v32, %s2535_s0 }
 0x42d   :  { %v2312_v34 = vpop.eup %2311 }
 0x42e   :  { %v351_v35 = vadd.f32 1.0, %v2312_v34 }
 0x430   :  { %2313 = vrcp.f32 %v351_v35 }
 0x43d   :  { %v2314_v36 = vpop.eup %2313 }
 0x43e   :  { %v355_v39 = vmul.f32 %v2314_v36, %v275_v9 }
 0x49e   :  { %v358_v37 = vpop.permute.xlu0 %357 }
 0x49f   :  { %v360_v38 = vmul.f32 %v2314_v36, %v358_v37 }
 0x4a1   :  { %362 = vrot.lane.b32.xlu1 %v360_v38, %s2541_s18 }
 0x513   :  { %v363_v40 = vpop.permute.xlu1 %362 }
 0x514   :  { %v365_v41 = vadd.f32 %v363_v40, %v355_v39 }
 0x516   :  { %2315 = vtanh.f32 %v365_v41 }
 0x523   :  { %v2316_v42 = vpop.eup %2315 }
 0x524   :  { %368 = vrot.lane.b32.xlu0 %v2316_v42, %s2535_s0 }
 0x596   :  { %v369_v44 = vpop.permute.xlu0 %368 }
 0x597   :  { %v2695_v47 = vmul.f32 %v2314_v36, %v369_v44 }
 0x599   :  { %376 = vrot.lane.b32.xlu0 %v2695_v47, %s2535_s0  ;;  %373 = vrot.lane.b32.xlu1 %v2695_v47, %s2541_s18 }
 0x59d   :  { %381 = vrot.lane.b32.xlu1 %v2647_v46, %s2546_s20 }
 0x60b   :  { %v377_v48 = vpop.permute.xlu0 %376  ;;  %v374_v49 = vpop.permute.xlu1 %373 }
 0x60c   :  { %v379_v50 = vsel %vm289_vm5, %v374_v49, %v377_v48 }
 0x60d   :  { %v380_v51 = vsel %vm2670_vm7, %v379_v50, 0.0 }
 0x60e   :  { %v392_v52 = vpack.c.bf16 %v380_v51, %v380_v51 }
 0x60f   :  { %v382_v54 = vpop.permute.xlu1 %381 }
 0x610   :  { %2039 = vmatmul.mubr.msk.bf16.vlgmr.msra.gmra.mxu0 %vm213_vm8, %v392_v52  ;;  %v384_v56 = vsel %vm180_vm1, %v2644_v45, %v382_v54  ;;  %v2549_v52 = vmov 4   ;;  %v906_v54 = vrot.slane %v2695_v47, 6 }
 0x611   :  { %387 = vperm.xlu0 %2261, %v384_v56   ;;  %2055 = vmatpush3.bf16.msra.mxu0 %v2602_v3 }
 0x612   :  { %2056 = vmatprep.subr.bf16.mxu0 %v2537_v1  ;;  %2062 = vmatprep.mubr.msk.bf16.mxu0 %vm2538_vm0, %v2537_v1 }
 0x615   :  { %2057 = vmatpush3.bf16.msra.mxu0 %v2605_v4  ;;  %2262 = vset.pattern.permute.xlu0 %v2547_v22 }
 0x616   :  { %2058 = vmatprep.subr.bf16.mxu0 %v2537_v1 }
 0x619   :  { %2059 = vmatpush3.bf16.msra.mxu0 %v2612_v11 }
 0x61a   :  { %2060 = vmatprep.subr.bf16.mxu0 %v2537_v1 }
 0x61d   :  { %2061 = vmatpush3.bf16.msra.mxu0 %v2622_v16 }
 0x61e   :  { %2078 = vmatprep.subr.bf16.mxu0 %v2537_v1 }
 0x68c   :  { %v388_v57 = vpop.permute.xlu0 %387 }
 0x68d   :  { %v390_v58 = vmul.f32 %v388_v57, %v2652_v53 }
 0x68f   :  { %v391_v59 = vadd.f32 %v390_v58, %v2654_v55 }
 0x6d0   :  { %v430_v60 = vpop.f32.mrf.mxu0 }
 0x6d1   :  { %v436_v61 = vadd.f32 %v430_v60, %v391_v59  ;;  %v919_v60 = vsel %vm180_vm1, %v2661_v15, %v906_v54 }
 0x6d2   :  { %v2040_v62 = vpop.f32.mrf.mxu0 }
 0x6d3   :  { %2317 = vtanh.f32 %v436_v61  ;;  %v1869_v7 = vmul.f32 -1.442695, %v436_v61 }
 0x6d4   :  { %v433_v63 = vpop.f32.mrf.mxu0 }
 0x6d5   :  { %2319 = vpow2.f32 %v1869_v7 }
 0x6d6   :  { %v2041_v5 = vpop.f32.mrf.mxu0 }
 0x6e0   :  { %v2318_v6 = vpop.eup %2317 }
 0x6e1   :  { %446 = vrot.lane.b32.xlu1 %v2318_v6, %s2535_s0 }
 0x6e2   :  { %v2320_v8 = vpop.eup %2319 }
 0x6e3   :  { %v440_v9 = vadd.f32 1.0, %v2320_v8 }
 0x6e5   :  { %2321 = vrcp.f32 %v440_v9 }
 0x6f2   :  { %v2322_v10 = vpop.eup %2321 }
 0x6f3   :  { %v444_v17 = vmul.f32 %v2322_v10, %v365_v41 }
 0x753   :  { %v447_v12 = vpop.permute.xlu1 %446 }
 0x754   :  { %v449_v14 = vmul.f32 %v2322_v10, %v447_v12 }
 0x756   :  { %451 = vrot.lane.b32.xlu1 %v449_v14, %s2541_s18 }
 0x7c8   :  { %v452_v19 = vpop.permute.xlu1 %451 }
 0x7c9   :  { %v454_v20 = vadd.f32 %v452_v19, %v444_v17 }
 0x7cb   :  { %2323 = vtanh.f32 %v454_v20 }
 0x7d8   :  { %v2324_v21 = vpop.eup %2323 }
 0x7d9   :  { %457 = vrot.lane.b32.xlu0 %v2324_v21, %s2535_s0 }
 0x84b   :  { %v458_v23 = vpop.permute.xlu0 %457 }
 0x84c   :  { %v2723_v0 = vmul.f32 %v2322_v10, %v458_v23 }
 0x84e   :  { %465 = vrot.lane.b32.xlu0 %v2723_v0, %s2535_s0  ;;  %462 = vrot.lane.b32.xlu1 %v2723_v0, %s2541_s18  ;;  %v908_v56 = vrot.slane %v2723_v0, 4 }
 0x850   :  { %v921_v61 = vsel %vm920_vm9, %v919_v60, %v908_v56 }
 0x852   :  { %470 = vrot.lane.b32.xlu1 %v2647_v46, %s2548_s21 }
 0x8c0   :  { %v466_v2 = vpop.permute.xlu0 %465  ;;  %v463_v24 = vpop.permute.xlu1 %462 }
 0x8c1   :  { %v468_v25 = vsel %vm289_vm5, %v463_v24, %v466_v2 }
 0x8c2   :  { %v469_v26 = vsel %vm2670_vm7, %v468_v25, 0.0 }
 0x8c3   :  { %v481_v27 = vpack.c.bf16 %v469_v26, %v469_v26 }
 0x8c4   :  { %v471_v28 = vpop.permute.xlu1 %470 }
 0x8c5   :  { %2051 = vmatmul.mubr.msk.bf16.vlgmr.msra.gmra.mxu1 %vm213_vm8, %v481_v27  ;;  %v473_v29 = vsel %vm180_vm1, %v2644_v45, %v471_v28 }
 0x8c6   :  { %476 = vperm.xlu0 %2262, %v473_v29   ;;  %2067 = vmatpush3.bf16.msra.mxu1 %v2602_v3 }
 0x8c7   :  { %2068 = vmatprep.subr.bf16.mxu1 %v2537_v1  ;;  %2074 = vmatprep.mubr.msk.bf16.mxu1 %vm2538_vm0, %v2537_v1 }
 0x8ca   :  { %2069 = vmatpush3.bf16.msra.mxu1 %v2605_v4  ;;  %2263 = vset.pattern.permute.xlu0 %v2549_v52 }
 0x8cb   :  { %2070 = vmatprep.subr.bf16.mxu1 %v2537_v1 }
 0x8ce   :  { %2071 = vmatpush3.bf16.msra.mxu1 %v2612_v11 }
 0x8cf   :  { %2072 = vmatprep.subr.bf16.mxu1 %v2537_v1 }
 0x8d2   :  { %2073 = vmatpush3.bf16.msra.mxu1 %v2622_v16 }
 0x8d3   :  { %2090 = vmatprep.subr.bf16.mxu1 %v2537_v1 }
 0x941   :  { %v477_v30 = vpop.permute.xlu0 %476 }
 0x942   :  { %v479_v31 = vmul.f32 %v477_v30, %v2652_v53 }
 0x944   :  { %v480_v32 = vadd.f32 %v479_v31, %v2654_v55 }
 0x985   :  { %v519_v33 = vpop.f32.mrf.mxu1 }
 0x986   :  { %v525_v34 = vadd.f32 %v519_v33, %v480_v32 }
 0x987   :  { %v2052_v35 = vpop.f32.mrf.mxu1 }
 0x988   :  { %2325 = vtanh.f32 %v525_v34  ;;  %v1871_v39 = vmul.f32 -1.442695, %v525_v34  ;;  %v2551_v34 = vmov 5  }
 0x989   :  { %v522_v36 = vpop.f32.mrf.mxu1 }
 0x98a   :  { %2327 = vpow2.f32 %v1871_v39 }
 0x98b   :  { %v2053_v37 = vpop.f32.mrf.mxu1 }
 0x995   :  { %v2326_v38 = vpop.eup %2325 }
 0x996   :  { %535 = vrot.lane.b32.xlu1 %v2326_v38, %s2535_s0 }
 0x997   :  { %v2328_v40 = vpop.eup %2327 }
 0x998   :  { %v529_v41 = vadd.f32 1.0, %v2328_v40 }
 0x99a   :  { %2329 = vrcp.f32 %v529_v41 }
 0x9a7   :  { %v2330_v42 = vpop.eup %2329 }
 0x9a8   :  { %v533_v48 = vmul.f32 %v2330_v42, %v454_v20 }
 0xa08   :  { %v536_v43 = vpop.permute.xlu1 %535 }
 0xa09   :  { %v538_v44 = vmul.f32 %v2330_v42, %v536_v43 }
 0xa0b   :  { %540 = vrot.lane.b32.xlu1 %v538_v44, %s2541_s18 }
 0xa7d   :  { %v541_v49 = vpop.permute.xlu1 %540 }
 0xa7e   :  { %v543_v50 = vadd.f32 %v541_v49, %v533_v48 }
 0xa80   :  { %2331 = vtanh.f32 %v543_v50 }
 0xa8d   :  { %v2332_v51 = vpop.eup %2331 }
 0xa8e   :  { %546 = vrot.lane.b32.xlu0 %v2332_v51, %s2535_s0 }
 0xb00   :  { %v547_v57 = vpop.permute.xlu0 %546 }
 0xb01   :  { %v549_v58 = vmul.f32 %v2330_v42, %v547_v57 }
 0xb03   :  { %v910_v59 = vrot.slane %v549_v58, 2  ;;  %554 = vrot.lane.b32.xlu0 %v549_v58, %s2535_s0  ;;  %551 = vrot.lane.b32.xlu1 %v549_v58, %s2541_s18 }
 0xb05   :  { %v2759_v62 = vsel %vm922_vm10, %v921_v61, %v910_v59  ;;  %v934_v47 = vsel %vm180_vm1, %v910_v59, %v2723_v0 }
 0xb06   :  { %v2764_v63 = vsel %vm920_vm9, %v934_v47, %v906_v54 }
 0xb07   :  { %559 = vrot.lane.b32.xlu1 %v2647_v46, %s2550_s22 }
 0xb75   :  { %v555_v5 = vpop.permute.xlu0 %554  ;;  %v552_v6 = vpop.permute.xlu1 %551 }
 0xb76   :  { %v557_v7 = vsel %vm289_vm5, %v552_v6, %v555_v5  ;;  %v2553_v6 = vmov 6  }
 0xb77   :  { %v558_v8 = vsel %vm2670_vm7, %v557_v7, 0.0 }
 0xb78   :  { %v570_v9 = vpack.c.bf16 %v558_v8, %v558_v8 }
 0xb79   :  { %v560_v10 = vpop.permute.xlu1 %559 }
 0xb7a   :  { %2063 = vmatmul.mubr.msk.bf16.vlgmr.msra.gmra.mxu0 %vm213_vm8, %v570_v9  ;;  %v562_v12 = vsel %vm180_vm1, %v2644_v45, %v560_v10 }
 0xb7b   :  { %565 = vperm.xlu0 %2263, %v562_v12   ;;  %2079 = vmatpush3.bf16.msra.mxu0 %v2602_v3 }
 0xb7c   :  { %2080 = vmatprep.subr.bf16.mxu0 %v2537_v1  ;;  %2086 = vmatprep.mubr.msk.bf16.mxu0 %vm2538_vm0, %v2537_v1 }
 0xb7f   :  { %2081 = vmatpush3.bf16.msra.mxu0 %v2605_v4  ;;  %2264 = vset.pattern.permute.xlu0 %v2551_v34 }
 0xb80   :  { %2082 = vmatprep.subr.bf16.mxu0 %v2537_v1 }
 0xb83   :  { %2083 = vmatpush3.bf16.msra.mxu0 %v2612_v11 }
 0xb84   :  { %2084 = vmatprep.subr.bf16.mxu0 %v2537_v1 }
 0xb87   :  { %2085 = vmatpush3.bf16.msra.mxu0 %v2622_v16 }
 0xb88   :  { %2102 = vmatprep.subr.bf16.mxu0 %v2537_v1 }
 0xbf6   :  { %v566_v14 = vpop.permute.xlu0 %565 }
 0xbf7   :  { %v568_v17 = vmul.f32 %v566_v14, %v2652_v53 }
 0xbf9   :  { %v569_v19 = vadd.f32 %v568_v17, %v2654_v55 }
 0xc3a   :  { %v608_v20 = vpop.f32.mrf.mxu0 }
 0xc3b   :  { %v614_v21 = vadd.f32 %v608_v20, %v569_v19 }
 0xc3c   :  { %v2064_v22 = vpop.f32.mrf.mxu0 }
 0xc3d   :  { %2333 = vtanh.f32 %v614_v21  ;;  %v1873_v24 = vmul.f32 -1.442695, %v614_v21 }
 0xc3e   :  { %v611_v23 = vpop.f32.mrf.mxu0 }
 0xc3f   :  { %2335 = vpow2.f32 %v1873_v24 }
 0xc40   :  { %v2065_v0 = vpop.f32.mrf.mxu0 }
 0xc4a   :  { %v2334_v2 = vpop.eup %2333 }
 0xc4b   :  { %624 = vrot.lane.b32.xlu1 %v2334_v2, %s2535_s0 }
 0xc4c   :  { %v2336_v25 = vpop.eup %2335 }
 0xc4d   :  { %v618_v26 = vadd.f32 1.0, %v2336_v25 }
 0xc4f   :  { %2337 = vrcp.f32 %v618_v26 }
 0xc5c   :  { %v2338_v27 = vpop.eup %2337 }
 0xc5d   :  { %v622_v30 = vmul.f32 %v2338_v27, %v543_v50 }
 0xcbd   :  { %v625_v28 = vpop.permute.xlu1 %624 }
 0xcbe   :  { %v627_v29 = vmul.f32 %v2338_v27, %v625_v28 }
 0xcc0   :  { %629 = vrot.lane.b32.xlu1 %v627_v29, %s2541_s18 }
 0xd32   :  { %v630_v31 = vpop.permute.xlu1 %629 }
 0xd33   :  { %v632_v32 = vadd.f32 %v630_v31, %v622_v30 }
 0xd35   :  { %2339 = vtanh.f32 %v632_v32 }
 0xd42   :  { %v2340_v33 = vpop.eup %2339 }
 0xd43   :  { %635 = vrot.lane.b32.xlu0 %v2340_v33, %s2535_s0 }
 0xdb5   :  { %v636_v35 = vpop.permute.xlu0 %635 }
 0xdb6   :  { %v2788_v36 = vmul.f32 %v2338_v27, %v636_v35 }
 0xdb8   :  { %643 = vrot.lane.b32.xlu0 %v2788_v36, %s2535_s0  ;;  %640 = vrot.lane.b32.xlu1 %v2788_v36, %s2541_s18 }
 0xdbc   :  { %648 = vrot.lane.b32.xlu1 %v2647_v46, %s2552_s23 }
 0xe2a   :  { %v644_v37 = vpop.permute.xlu0 %643  ;;  %v641_v38 = vpop.permute.xlu1 %640 }
 0xe2b   :  { %v646_v39 = vsel %vm289_vm5, %v641_v38, %v644_v37 }
 0xe2c   :  { %v647_v40 = vsel %vm2670_vm7, %v646_v39, 0.0  ;;  %v2555_v39 = vmov 7  }
 0xe2d   :  { %v659_v41 = vpack.c.bf16 %v647_v40, %v647_v40 }
 0xe2e   :  { %v649_v42 = vpop.permute.xlu1 %648 }
 0xe2f   :  { %2075 = vmatmul.mubr.msk.bf16.vlgmr.msra.gmra.mxu1 %vm213_vm8, %v659_v41  ;;  %v651_v43 = vsel %vm180_vm1, %v2644_v45, %v649_v42 }
 0xe30   :  { %654 = vperm.xlu0 %2264, %v651_v43   ;;  %2091 = vmatpush3.bf16.msra.mxu1 %v2602_v3 }
 0xe31   :  { %2092 = vmatprep.subr.bf16.mxu1 %v2537_v1  ;;  %2098 = vmatprep.mubr.msk.bf16.mxu1 %vm2538_vm0, %v2537_v1 }
 0xe34   :  { %2093 = vmatpush3.bf16.msra.mxu1 %v2605_v4  ;;  %2265 = vset.pattern.permute.xlu0 %v2553_v6  ;;  %v2281_v6 = vld [vmem:[#allocation9 + $0x38] sm:$0xff]  }
 0xe35   :  { %2094 = vmatprep.subr.bf16.mxu1 %v2537_v1 }
 0xe38   :  { %2095 = vmatpush3.bf16.msra.mxu1 %v2612_v11 }
 0xe39   :  { %2096 = vmatprep.subr.bf16.mxu1 %v2537_v1 }
 0xe3c   :  { %2097 = vmatpush3.bf16.msra.mxu1 %v2622_v16 }
 0xe3d   :  { %2114 = vmatprep.subr.bf16.mxu1 %v2537_v1 }
 0xeab   :  { %v655_v44 = vpop.permute.xlu0 %654 }
 0xeac   :  { %v657_v3 = vmul.f32 %v655_v44, %v2652_v53 }
 0xeae   :  { %v658_v48 = vadd.f32 %v657_v3, %v2654_v55 }
 0xeef   :  { %v697_v49 = vpop.f32.mrf.mxu1 }
 0xef0   :  { %v703_v50 = vadd.f32 %v697_v49, %v658_v48 }
 0xef1   :  { %v2076_v51 = vpop.f32.mrf.mxu1 }
 0xef2   :  { %2341 = vtanh.f32 %v703_v50  ;;  %v1875_v11 = vmul.f32 -1.442695, %v703_v50 }
 0xef3   :  { %v700_v4 = vpop.f32.mrf.mxu1 }
 0xef4   :  { %2343 = vpow2.f32 %v1875_v11 }
 0xef5   :  { %v2077_v52 = vpop.f32.mrf.mxu1 }
 0xeff   :  { %v2342_v54 = vpop.eup %2341 }
 0xf00   :  { %713 = vrot.lane.b32.xlu1 %v2342_v54, %s2535_s0 }
 0xf01   :  { %v2344_v56 = vpop.eup %2343 }
 0xf02   :  { %v707_v16 = vadd.f32 1.0, %v2344_v56 }
 0xf04   :  { %2345 = vrcp.f32 %v707_v16 }
 0xf11   :  { %v2346_v57 = vpop.eup %2345 }
 0xf12   :  { %v711_v60 = vmul.f32 %v2346_v57, %v632_v32 }
 0xf72   :  { %v714_v58 = vpop.permute.xlu1 %713 }
 0xf73   :  { %v716_v59 = vmul.f32 %v2346_v57, %v714_v58 }
 0xf75   :  { %718 = vrot.lane.b32.xlu1 %v716_v59, %s2541_s18 }
 0xfe7   :  { %v719_v61 = vpop.permute.xlu1 %718 }
 0xfe8   :  { %v721_v47 = vadd.f32 %v719_v61, %v711_v60 }
 0xfea   :  { %2347 = vtanh.f32 %v721_v47 }
 0xff7   :  { %v2348_v5 = vpop.eup %2347 }
 0xff8   :  { %724 = vrot.lane.b32.xlu0 %v2348_v5, %s2535_s0 }
0x106a   :  { %v725_v7 = vpop.permute.xlu0 %724 }
0x106b   :  { %v2816_v8 = vmul.f32 %v2346_v57, %v725_v7  ;;  %v2282_v7 = vld [vmem:[#allocation9 + $0x58] sm:$0xff]  }
0x106d   :  { %732 = vrot.lane.b32.xlu0 %v2816_v8, %s2535_s0  ;;  %729 = vrot.lane.b32.xlu1 %v2816_v8, %s2541_s18 }
0x1071   :  { %737 = vrot.lane.b32.xlu1 %v2647_v46, %s2554_s24 }
0x10df   :  { %v733_v9 = vpop.permute.xlu0 %732  ;;  %v730_v10 = vpop.permute.xlu1 %729 }
0x10e0   :  { %v735_v12 = vsel %vm289_vm5, %v730_v10, %v733_v9  ;;  %v2283_v9 = vld [vmem:[#allocation9 + $0x30] sm:$0xff]  }
0x10e1   :  { %v736_v14 = vsel %vm2670_vm7, %v735_v12, 0.0  ;;  %v2284_v10 = vld [vmem:[#allocation9 + $0x50] sm:$0xff]  }
0x10e2   :  { %v748_v17 = vpack.c.bf16 %v736_v14, %v736_v14  ;;  %v2285_v14 = vld [vmem:[#allocation9 + $0x28] sm:$0xff]  }
0x10e3   :  { %v738_v19 = vpop.permute.xlu1 %737 }
0x10e4   :  { %2087 = vmatmul.mubr.msk.bf16.vlgmr.msra.gmra.mxu0 %vm213_vm8, %v748_v17  ;;  %v740_v20 = vsel %vm180_vm1, %v2644_v45, %v738_v19  ;;  %v2286_v17 = vld [vmem:[#allocation9 + $0x48] sm:$0xff]   ;;  %v2287_v19 = vld [vmem:[#allocation9 + $0x20] sm:$0xff]  }
0x10e5   :  { %743 = vperm.xlu0 %2265, %v740_v20   ;;  %2110 = vmatprep.mubr.msk.bf16.mxu0 %vm2538_vm0, %v2537_v1  ;;  %v2288_v20 = vld [vmem:[#allocation9 + $0x40] sm:$0xff]  }
0x10e6   :  { %2103 = vmatpush3.bf16.msra.mxu0 %v2281_v6 }
0x10e7   :  { %2104 = vmatprep.subr.bf16.mxu0 %v2537_v1 }
0x10e9   :  { %2266 = vset.pattern.permute.xlu0 %v2555_v39 }
0x10ea   :  { %2105 = vmatpush3.bf16.msra.mxu0 %v2283_v9 }
0x10eb   :  { %2106 = vmatprep.subr.bf16.mxu0 %v2537_v1 }
0x10ee   :  { %2107 = vmatpush3.bf16.msra.mxu0 %v2285_v14 }
0x10ef   :  { %2108 = vmatprep.subr.bf16.mxu0 %v2537_v1 }
0x10f2   :  { %2109 = vmatpush3.bf16.msra.mxu0 %v2287_v19 }
0x10f3   :  { %2126 = vmatprep.subr.bf16.mxu0 %v2537_v1 }
0x1160   :  { %v744_v21 = vpop.permute.xlu0 %743 }
0x1161   :  { %v746_v22 = vmul.f32 %v744_v21, %v2652_v53  ;;  %v912_v21 = vrot.slane %v2816_v8, 6 }
0x1163   :  { %v747_v23 = vadd.f32 %v746_v22, %v2654_v55 }
0x11a4   :  { %v786_v0 = vpop.f32.mrf.mxu0 }
0x11a5   :  { %v792_v2 = vadd.f32 %v786_v0, %v747_v23 }
0x11a6   :  { %v2088_v24 = vpop.f32.mrf.mxu0 }
0x11a7   :  { %2349 = vtanh.f32 %v792_v2  ;;  %v1877_v28 = vmul.f32 -1.442695, %v792_v2  ;;  %v924_v24 = vsel %vm180_vm1, %v2788_v36, %v912_v21 }
0x11a8   :  { %v789_v25 = vpop.f32.mrf.mxu0 }
0x11a9   :  { %2351 = vpow2.f32 %v1877_v28  ;;  %v929_v28 = vrot.slane %v2661_v15, 4 }
0x11aa   :  { %v2089_v26 = vpop.f32.mrf.mxu0 }
0x11b4   :  { %v2350_v27 = vpop.eup %2349 }
0x11b5   :  { %802 = vrot.lane.b32.xlu1 %v2350_v27, %s2535_s0  ;;  %v927_v27 = vrot.slane %v2788_v36, 4 }
0x11b6   :  { %v2352_v29 = vpop.eup %2351 }
0x11b7   :  { %v796_v30 = vadd.f32 1.0, %v2352_v29 }
0x11b9   :  { %2353 = vrcp.f32 %v796_v30 }
0x11c6   :  { %v2354_v31 = vpop.eup %2353 }
0x11c7   :  { %v800_v34 = vmul.f32 %v2354_v31, %v721_v47 }
0x1227   :  { %v803_v32 = vpop.permute.xlu1 %802 }
0x1228   :  { %v805_v33 = vmul.f32 %v2354_v31, %v803_v32  ;;  %v936_v32 = vsel %vm922_vm10, %v2764_v63, %v929_v28  ;;  %v2888_v63 = vld [vmem:[#allocation9 + $0x70] sm:$0xff]  }
0x122a   :  { %807 = vrot.lane.b32.xlu1 %v805_v33, %s2541_s18 }
0x129c   :  { %v808_v35 = vpop.permute.xlu1 %807 }
0x129d   :  { %v810_v37 = vadd.f32 %v808_v35, %v800_v34 }
0x129f   :  { %2355 = vtanh.f32 %v810_v37 }
0x12ac   :  { %v2356_v38 = vpop.eup %2355 }
0x12ad   :  { %813 = vrot.lane.b32.xlu0 %v2356_v38, %s2535_s0 }
0x131f   :  { %v814_v40 = vpop.permute.xlu0 %813 }
0x1320   :  { %v2836_v41 = vmul.f32 %v2354_v31, %v814_v40  ;;  %v2883_v40 = vld [vmem:[#allocation9 + $0x78] sm:$0xff]  }
0x1322   :  { %821 = vrot.lane.b32.xlu0 %v2836_v41, %s2535_s0  ;;  %818 = vrot.lane.b32.xlu1 %v2836_v41, %s2541_s18  ;;  %v914_v22 = vrot.slane %v2836_v41, 4 }
0x1324   :  { %v925_v25 = vsel %vm920_vm9, %v924_v24, %v914_v22 }
0x1326   :  { %826 = vrot.lane.b32.xlu1 %v2647_v46, %s2556_s25 }
0x1394   :  { %v822_v42 = vpop.permute.xlu0 %821  ;;  %v819_v43 = vpop.permute.xlu1 %818 }
0x1395   :  { %v824_v44 = vsel %vm289_vm5, %v819_v43, %v822_v42  ;;  %v2898_v42 = vld [vmem:[#allocation9 + $0x68] sm:$0xff]   ;;  %v2904_v43 = vld [vmem:[#allocation9 + $0x60] sm:$0xff]  }
0x1396   :  { %v825_v3 = vsel %vm2670_vm7, %v824_v44, 0.0 }
0x1397   :  { %v837_v48 = vpack.c.bf16 %v825_v3, %v825_v3 }
0x1398   :  { %v827_v49 = vpop.permute.xlu1 %826 }
0x1399   :  { %2099 = vmatmul.mubr.msk.bf16.vlgmr.msra.gmra.mxu1 %vm213_vm8, %v837_v48  ;;  %v829_v50 = vsel %vm180_vm1, %v2644_v45, %v827_v49 }
0x139a   :  { %832 = vperm.xlu0 %2266, %v829_v50   ;;  %2122 = vmatprep.mubr.msk.bf16.mxu1 %vm2538_vm0, %v2537_v1 }
0x139b   :  { %2115 = vmatpush3.bf16.msra.mxu1 %v2282_v7 }
0x139c   :  { %2116 = vmatprep.subr.bf16.mxu1 %v2537_v1 }
0x139f   :  { %2117 = vmatpush3.bf16.msra.mxu1 %v2284_v10 }
0x13a0   :  { %2118 = vmatprep.subr.bf16.mxu1 %v2537_v1 }
0x13a3   :  { %2119 = vmatpush3.bf16.msra.mxu1 %v2286_v17 }
0x13a4   :  { %2120 = vmatprep.subr.bf16.mxu1 %v2537_v1 }
0x13a7   :  { %2121 = vmatpush3.bf16.msra.mxu1 %v2288_v20 }
0x13a8   :  { %2138 = vmatprep.subr.bf16.mxu1 %v2537_v1 }
0x1415   :  { %v833_v51 = vpop.permute.xlu0 %832 }
0x1416   :  { %v835_v46 = vmul.f32 %v833_v51, %v2652_v53 }
0x1418   :  { %v836_v4 = vadd.f32 %v835_v46, %v2654_v55 }
0x1459   :  { %v875_v52 = vpop.f32.mrf.mxu1 }
0x145a   :  { %v881_v54 = vadd.f32 %v875_v52, %v836_v4 }
0x145b   :  { %v2100_v11 = vpop.f32.mrf.mxu1 }
0x145c   :  { %2357 = vtanh.f32 %v881_v54  ;;  %v1879_v58 = vmul.f32 -1.442695, %v881_v54  ;;  %v73_v54 = vld [vmem:[#allocation7 + $0x10] sm:$0xf] }
0x145d   :  { %v878_v56 = vpop.f32.mrf.mxu1 }
0x145e   :  { %2359 = vpow2.f32 %v1879_v58 }
0x145f   :  { %v2101_v16 = vpop.f32.mrf.mxu1 }
0x1469   :  { %v2358_v57 = vpop.eup %2357 }
0x146a   :  { %891 = vrot.lane.b32.xlu1 %v2358_v57, %s2535_s0 }
0x146b   :  { %v2360_v45 = vpop.eup %2359 }
0x146c   :  { %v885_v59 = vadd.f32 1.0, %v2360_v45 }
0x146e   :  { %2361 = vrcp.f32 %v885_v59 }
0x147b   :  { %v2362_v60 = vpop.eup %2361 }
0x147c   :  { %v889_v53 = vmul.f32 %v2362_v60, %v810_v37 }
0x14dc   :  { %v892_v61 = vpop.permute.xlu1 %891 }
0x14dd   :  { %v894_v47 = vmul.f32 %v2362_v60, %v892_v61 }
0x14df   :  { %896 = vrot.lane.b32.xlu1 %v894_v47, %s2541_s18 }
0x1551   :  { %v897_v55 = vpop.permute.xlu1 %896 }
0x1552   :  { %v899_v5 = vadd.f32 %v897_v55, %v889_v53 }
0x1554   :  { %2363 = vtanh.f32 %v899_v5 }
0x1561   :  { %v2364_v12 = vpop.eup %2363 }
0x1562   :  { %902 = vrot.lane.b32.xlu0 %v2364_v12, %s2535_s0 }
0x15d4   :  { %v903_v23 = vpop.permute.xlu0 %902 }
0x15d5   :  { %v905_v0 = vmul.f32 %v2362_v60, %v903_v23 }
0x15d7   :  { %v917_v2 = vrot.slane %v905_v0, 2 }
0x15d9   :  { %v931_v26 = vsel %vm180_vm1, %v917_v2, %v2836_v41  ;;  %v926_v8 = vsel %vm922_vm10, %v925_v25, %v917_v2 }
0x15da   :  { %v2267_v29 = vpack.i.bf16 %v926_v8, %v2759_v62  ;;  %v932_v30 = vsel %vm920_vm9, %v931_v26, %v912_v21 }
0x15db   :  { %v933_v31 = vsel %vm922_vm10, %v932_v30, %v927_v27 }
0x15dc   :  { %2268 = vrot.lane.b32.xlu1 %v2267_v29, %s2541_s18  ;;  %v2272_v33 = vpack.i.bf16 %v936_v32, %v933_v31 }
0x15de   :  { %2273 = vrot.lane.b32.xlu0 %v2272_v33, %s2535_s0 }
0x164e   :  { %v2269_v34 = vpop.permute.xlu1 %2268 }
0x164f   :  { %v2271_v37 = vunpack.i.h.bf16 %v2269_v34  ;;  %v2270_v36 = vunpack.i.l.bf16 %v2269_v34 }
0x1650   :  { %v2274_v35 = vpop.permute.xlu0 %2273 }
0x1651   :  { %v2276_v38 = vunpack.i.h.bf16 %v2274_v35  ;;  %v2275_v15 = vunpack.i.l.bf16 %v2274_v35 }
0x1653   :  { %v954_v62 = vsel %vm289_vm5, %v2271_v37, %v2276_v38  ;;  %v953_v39 = vsel %vm289_vm5, %v2270_v36, %v2275_v15 }
0x1654   :  { %v955_v41 = vpack.c.bf16 %v954_v62, %v953_v39 }
0x1656   :  { %2111 = vmatmul.mubr.msk.bf16.vlgmr.msra.gmra.mxu0 %vm213_vm8, %v955_v41  ;;  %2123 = vmatmul.mubr.msk.bf16.vlgmr.msra.gmra.mxu1 %vm213_vm8, %v955_v41 }
0x1657   :  { %2127 = vmatpush3.bf16.msra.mxu0 %v2883_v40  ;;  %2134 = vmatprep.mubr.msk.bf16.mxu0 %vm2538_vm0, %v2537_v1 }
0x1658   :  { %2128 = vmatprep.subr.bf16.mxu0 %v2537_v1  ;;  %2139 = vmatpush3.bf16.msra.mxu1 %v2883_v40 }
0x1659   :  { %2140 = vmatprep.subr.bf16.mxu1 %v2537_v1  ;;  %2146 = vmatprep.mubr.msk.bf16.mxu1 %vm2538_vm0, %v2537_v1 }
0x165b   :  { %2129 = vmatpush3.bf16.msra.mxu0 %v2888_v63 }
0x165c   :  { %2130 = vmatprep.subr.bf16.mxu0 %v2537_v1  ;;  %2141 = vmatpush3.bf16.msra.mxu1 %v2888_v63 }
0x165d   :  { %2142 = vmatprep.subr.bf16.mxu1 %v2537_v1 }
0x165f   :  { %2131 = vmatpush3.bf16.msra.mxu0 %v2898_v42 }
0x1660   :  { %2132 = vmatprep.subr.bf16.mxu0 %v2537_v1  ;;  %2143 = vmatpush3.bf16.msra.mxu1 %v2898_v42 }
0x1661   :  { %2144 = vmatprep.subr.bf16.mxu1 %v2537_v1 }
0x1663   :  { %2133 = vmatpush3.bf16.msra.mxu0 %v2904_v43 }
0x1664   :  { %2145 = vmatpush3.bf16.msra.mxu1 %v2904_v43  ;;  %2150 = vmatprep.subr.bf16.mxu0 %v2537_v1 }
0x1665   :  { %2162 = vmatprep.subr.bf16.mxu1 %v2537_v1 }
0x1666   :  { %2135 = vmatmul.mubr.bf16.vlgmr.msra.gmra.mxu0 %v2539_v13 }
0x1667   :  { %2151 = vmatpush3.bf16.msra.mxu0 %v2883_v40  ;;  %2158 = vmatprep.mubr.msk.bf16.mxu0 %vm2538_vm0, %v2537_v1 }
0x1668   :  { %2152 = vmatprep.subr.bf16.mxu0 %v2537_v1 }
0x166b   :  { %2153 = vmatpush3.bf16.msra.mxu0 %v2888_v63 }
0x166c   :  { %2154 = vmatprep.subr.bf16.mxu0 %v2537_v1 }
0x166f   :  { %2155 = vmatpush3.bf16.msra.mxu0 %v2898_v42 }
0x1670   :  { %2156 = vmatprep.subr.bf16.mxu0 %v2537_v1 }
0x1673   :  { %2157 = vmatpush3.bf16.msra.mxu0 %v2904_v43 }
0x1674   :  { %2174 = vmatprep.subr.bf16.mxu0 %v2537_v1 }
0x1716   :  { %v1017_v13 = vpop.f32.mrf.mxu0  ;;  %v1082_v44 = vpop.f32.mrf.mxu1 }
0x1717   :  { %v1193_v49 = vrot.slane %v1017_v13, 2  ;;  %v1277_v50 = vrot.slane %v1017_v13, 4  ;;  %v1359_v51 = vrot.slane %v1017_v13, 6  ;;  %v1444_v46 = vrot.slane %v1082_v44, 4 }
0x1718   :  { %v2112_v3 = vpop.f32.mrf.mxu0  ;;  %v2124_v48 = vpop.f32.mrf.mxu1  ;;  %v1529_v11 = vrot.slane %v1082_v44, 2  ;;  %v1695_v53 = vrot.slane %v1082_v44, 6 }
0x171a   :  { %v1020_v4 = vpop.f32.mrf.mxu0  ;;  %v1085_v52 = vpop.f32.mrf.mxu1 }
0x171b   :  { %v1527_v56 = vrot.slane %v1020_v4, 2  ;;  %v1611_v16 = vrot.slane %v1020_v4, 4  ;;  %v1693_v57 = vrot.slane %v1020_v4, 6  ;;  %v1195_v58 = vrot.slane %v1085_v52, 2 }
0x171c   :  { %v1361_v45 = vrot.slane %v1085_v52, 6  ;;  %v2113_v59 = vpop.f32.mrf.mxu0  ;;  %v2125_v60 = vpop.f32.mrf.mxu1  ;;  %v1279_v61 = vsel %vm180_vm1, %v1277_v50, %v1085_v52  ;;  %v1446_v47 = vsel %vm180_vm1, %v1020_v4, %v1444_v46  ;;  %v1090_v7 = vrot.slane %v1085_v52, 4 }
0x171d   :  { %v2926_v55 = vadd.f32 %v1279_v61, %v73_v54  ;;  %v2928_v5 = vadd.f32 %v1446_v47, %v73_v54  ;;  %v1531_v6 = vsel %vm180_vm1, %v1527_v56, %v1529_v11  ;;  %v1197_v9 = vsel %vm180_vm1, %v1193_v49, %v1195_v58 }
0x171e   :  { %v1363_v10 = vsel %vm180_vm1, %v1359_v51, %v1361_v45  ;;  %v2933_v12 = vadd.f32 %v1531_v6, %v73_v54  ;;  %v1198_v14 = vadd.f32 %v1197_v9, %v73_v54  ;;  %v1613_v19 = vsel %vm180_vm1, %v1611_v16, %v1082_v44 }
0x171f   :  { %v2935_v17 = vadd.f32 %v1363_v10, %v73_v54  ;;  %v1697_v20 = vsel %vm180_vm1, %v1693_v57, %v1695_v53  ;;  %v2939_v21 = vadd.f32 %v1613_v19, %v73_v54  ;;  %v1092_v23 = vsel %vm180_vm1, %v1017_v13, %v1090_v7 }
0x1720   :  { %v2941_v22 = vadd.f32 %v1697_v20, %v73_v54  ;;  %v1093_v0 = vadd.f32 %v1092_v23, %v73_v54 }
0x1726   :  { %v1152_v2 = vpop.f32.mrf.mxu0 }
0x1727   :  { %v1158_v24 = vadd.f32 %v1152_v2, %v1093_v0 }
0x1728   :  { %v2136_v25 = vpop.f32.mrf.mxu0 }
0x1729   :  { %2365 = vtanh.f32 %v1158_v24  ;;  %v1894_v28 = vmul.f32 -1.442695, %v1158_v24 }
0x172a   :  { %v1155_v26 = vpop.f32.mrf.mxu0 }
0x172b   :  { %2367 = vpow2.f32 %v1894_v28 }
0x172c   :  { %v2137_v8 = vpop.f32.mrf.mxu0 }
0x1736   :  { %v2366_v27 = vpop.eup %2365 }
0x1737   :  { %1168 = vrot.lane.b32.xlu1 %v2366_v27, %s2535_s0 }
0x1738   :  { %v2368_v29 = vpop.eup %2367 }
0x1739   :  { %v1162_v30 = vadd.f32 1.0, %v2368_v29 }
0x173b   :  { %2369 = vrcp.f32 %v1162_v30 }
0x1748   :  { %v2370_v31 = vpop.eup %2369 }
0x1749   :  { %v1166_v34 = vmul.f32 0.0, %v2370_v31 }
0x17a9   :  { %v1169_v32 = vpop.permute.xlu1 %1168 }
0x17aa   :  { %v1171_v33 = vmul.f32 %v2370_v31, %v1169_v32 }
0x17ac   :  { %1173 = vrot.lane.b32.xlu0 %v1171_v33, %s2541_s18 }
0x181e   :  { %v1174_v35 = vpop.permute.xlu0 %1173 }
0x181f   :  { %v1176_v37 = vadd.f32 %v1174_v35, %v1166_v34 }
0x1821   :  { %2371 = vtanh.f32 %v1176_v37 }
0x182e   :  { %v2372_v36 = vpop.eup %2371 }
0x182f   :  { %1179 = vrot.lane.b32.xlu1 %v2372_v36, %s2535_s0 }
0x18a1   :  { %v1180_v38 = vpop.permute.xlu1 %1179 }
0x18a2   :  { %v1182_v15 = vmul.f32 %v2370_v31, %v1180_v38 }
0x18a4   :  { %1187 = vrot.lane.b32.xlu1 %v1182_v15, %s2535_s0  ;;  %1184 = vrot.lane.b32.xlu0 %v1182_v15, %s2541_s18 }
0x1916   :  { %v1188_v62 = vpop.permute.xlu1 %1187  ;;  %v1185_v39 = vpop.permute.xlu0 %1184 }
0x1917   :  { %v1190_v41 = vsel %vm289_vm5, %v1185_v39, %v1188_v62 }
0x1918   :  { %v1191_v13 = vsel %vm2670_vm7, %v1190_v41, 0.0 }
0x1919   :  { %v1199_v44 = vpack.c.bf16 %v1191_v13, %v1191_v13 }
0x191b   :  { %2147 = vmatmul.mubr.msk.bf16.vlgmr.msra.gmra.mxu1 %vm213_vm8, %v1199_v44 }
0x191c   :  { %2163 = vmatpush3.bf16.msra.mxu1 %v2883_v40  ;;  %2170 = vmatprep.mubr.msk.bf16.mxu1 %vm2538_vm0, %v2537_v1 }
0x191d   :  { %2164 = vmatprep.subr.bf16.mxu1 %v2537_v1 }
0x1920   :  { %2165 = vmatpush3.bf16.msra.mxu1 %v2888_v63 }
0x1921   :  { %2166 = vmatprep.subr.bf16.mxu1 %v2537_v1 }
0x1924   :  { %2167 = vmatpush3.bf16.msra.mxu1 %v2898_v42 }
0x1925   :  { %2168 = vmatprep.subr.bf16.mxu1 %v2537_v1 }
0x1928   :  { %2169 = vmatpush3.bf16.msra.mxu1 %v2904_v43 }
0x1929   :  { %2186 = vmatprep.subr.bf16.mxu1 %v2537_v1 }
0x19db   :  { %v1237_v3 = vpop.f32.mrf.mxu1 }
0x19dc   :  { %v1243_v48 = vadd.f32 %v1237_v3, %v1198_v14 }
0x19dd   :  { %v2148_v49 = vpop.f32.mrf.mxu1 }
0x19de   :  { %2373 = vtanh.f32 %v1243_v48  ;;  %v1896_v4 = vmul.f32 -1.442695, %v1243_v48 }
0x19df   :  { %v1240_v50 = vpop.f32.mrf.mxu1 }
0x19e0   :  { %2375 = vpow2.f32 %v1896_v4 }
0x19e1   :  { %v2149_v51 = vpop.f32.mrf.mxu1 }
0x19eb   :  { %v2374_v46 = vpop.eup %2373 }
0x19ec   :  { %1253 = vrot.lane.b32.xlu0 %v2374_v46, %s2535_s0 }
0x19ed   :  { %v2376_v52 = vpop.eup %2375 }
0x19ee   :  { %v1247_v54 = vadd.f32 1.0, %v2376_v52 }
0x19f0   :  { %2377 = vrcp.f32 %v1247_v54 }
0x19fd   :  { %v2378_v11 = vpop.eup %2377 }
0x19fe   :  { %v1251_v57 = vmul.f32 %v2378_v11, %v1176_v37 }
0x1a5e   :  { %v1254_v56 = vpop.permute.xlu0 %1253 }
0x1a5f   :  { %v1256_v16 = vmul.f32 %v2378_v11, %v1254_v56 }
0x1a61   :  { %1258 = vrot.lane.b32.xlu1 %v1256_v16, %s2541_s18 }
0x1ad3   :  { %v1259_v58 = vpop.permute.xlu1 %1258 }
0x1ad4   :  { %v1261_v45 = vadd.f32 %v1259_v58, %v1251_v57 }
0x1ad6   :  { %2379 = vtanh.f32 %v1261_v45 }
0x1ae3   :  { %v2380_v59 = vpop.eup %2379 }
0x1ae4   :  { %1264 = vrot.lane.b32.xlu0 %v2380_v59, %s2535_s0 }
0x1b56   :  { %v1265_v60 = vpop.permute.xlu0 %1264 }
0x1b57   :  { %v1267_v61 = vmul.f32 %v2378_v11, %v1265_v60 }
0x1b59   :  { %1272 = vrot.lane.b32.xlu0 %v1267_v61, %s2535_s0  ;;  %1269 = vrot.lane.b32.xlu1 %v1267_v61, %s2541_s18 }
0x1bcb   :  { %v1273_v47 = vpop.permute.xlu0 %1272  ;;  %v1270_v53 = vpop.permute.xlu1 %1269 }
0x1bcc   :  { %v1275_v6 = vsel %vm289_vm5, %v1270_v53, %v1273_v47 }
0x1bcd   :  { %v1276_v7 = vsel %vm2670_vm7, %v1275_v6, 0.0 }
0x1bce   :  { %v1281_v9 = vpack.c.bf16 %v1276_v7, %v1276_v7 }
0x1bd0   :  { %2159 = vmatmul.mubr.msk.bf16.vlgmr.msra.gmra.mxu0 %vm213_vm8, %v1281_v9 }
0x1bd1   :  { %2175 = vmatpush3.bf16.msra.mxu0 %v2883_v40  ;;  %2182 = vmatprep.mubr.msk.bf16.mxu0 %vm2538_vm0, %v2537_v1 }
0x1bd2   :  { %2176 = vmatprep.subr.bf16.mxu0 %v2537_v1 }
0x1bd5   :  { %2177 = vmatpush3.bf16.msra.mxu0 %v2888_v63 }
0x1bd6   :  { %2178 = vmatprep.subr.bf16.mxu0 %v2537_v1 }
0x1bd9   :  { %2179 = vmatpush3.bf16.msra.mxu0 %v2898_v42 }
0x1bda   :  { %2180 = vmatprep.subr.bf16.mxu0 %v2537_v1 }
0x1bdd   :  { %2181 = vmatpush3.bf16.msra.mxu0 %v2904_v43 }
0x1bde   :  { %2198 = vmatprep.subr.bf16.mxu0 %v2537_v1 }
0x1c90   :  { %v1319_v10 = vpop.f32.mrf.mxu0 }
0x1c91   :  { %v1325_v14 = vadd.f32 %v1319_v10, %v2926_v55 }
0x1c92   :  { %v2160_v19 = vpop.f32.mrf.mxu0 }
0x1c93   :  { %2381 = vtanh.f32 %v1325_v14  ;;  %v1898_v2 = vmul.f32 -1.442695, %v1325_v14 }
0x1c94   :  { %v1322_v20 = vpop.f32.mrf.mxu0 }
0x1c95   :  { %2383 = vpow2.f32 %v1898_v2 }
0x1c96   :  { %v2161_v23 = vpop.f32.mrf.mxu0 }
0x1ca0   :  { %v2382_v0 = vpop.eup %2381 }
0x1ca1   :  { %1335 = vrot.lane.b32.xlu1 %v2382_v0, %s2535_s0 }
0x1ca2   :  { %v2384_v24 = vpop.eup %2383 }
0x1ca3   :  { %v1329_v25 = vadd.f32 1.0, %v2384_v24 }
0x1ca5   :  { %2385 = vrcp.f32 %v1329_v25 }
0x1cb2   :  { %v2386_v26 = vpop.eup %2385 }
0x1cb3   :  { %v1333_v28 = vmul.f32 %v2386_v26, %v1261_v45 }
0x1d13   :  { %v1336_v8 = vpop.permute.xlu1 %1335 }
0x1d14   :  { %v1338_v27 = vmul.f32 %v2386_v26, %v1336_v8 }
0x1d16   :  { %1340 = vrot.lane.b32.xlu0 %v1338_v27, %s2541_s18 }
0x1d88   :  { %v1341_v29 = vpop.permute.xlu0 %1340 }
0x1d89   :  { %v1343_v55 = vadd.f32 %v1341_v29, %v1333_v28 }
0x1d8b   :  { %2387 = vtanh.f32 %v1343_v55 }
0x1d98   :  { %v2388_v30 = vpop.eup %2387 }
0x1d99   :  { %1346 = vrot.lane.b32.xlu1 %v2388_v30, %s2535_s0 }
0x1e0b   :  { %v1347_v31 = vpop.permute.xlu1 %1346 }
0x1e0c   :  { %v1349_v32 = vmul.f32 %v2386_v26, %v1347_v31 }
0x1e0e   :  { %1354 = vrot.lane.b32.xlu1 %v1349_v32, %s2535_s0  ;;  %1351 = vrot.lane.b32.xlu0 %v1349_v32, %s2541_s18 }
0x1e80   :  { %v1355_v33 = vpop.permute.xlu1 %1354  ;;  %v1352_v34 = vpop.permute.xlu0 %1351 }
0x1e81   :  { %v1357_v35 = vsel %vm289_vm5, %v1352_v34, %v1355_v33 }
0x1e82   :  { %v1358_v37 = vsel %vm2670_vm7, %v1357_v35, 0.0 }
0x1e83   :  { %v1365_v36 = vpack.c.bf16 %v1358_v37, %v1358_v37 }
0x1e85   :  { %2171 = vmatmul.mubr.msk.bf16.vlgmr.msra.gmra.mxu1 %vm213_vm8, %v1365_v36 }
0x1e86   :  { %2187 = vmatpush3.bf16.msra.mxu1 %v2883_v40  ;;  %2194 = vmatprep.mubr.msk.bf16.mxu1 %vm2538_vm0, %v2537_v1 }
0x1e87   :  { %2188 = vmatprep.subr.bf16.mxu1 %v2537_v1 }
0x1e8a   :  { %2189 = vmatpush3.bf16.msra.mxu1 %v2888_v63 }
0x1e8b   :  { %2190 = vmatprep.subr.bf16.mxu1 %v2537_v1 }
0x1e8e   :  { %2191 = vmatpush3.bf16.msra.mxu1 %v2898_v42 }
0x1e8f   :  { %2192 = vmatprep.subr.bf16.mxu1 %v2537_v1 }
0x1e92   :  { %2193 = vmatpush3.bf16.msra.mxu1 %v2904_v43 }
0x1e93   :  { %2210 = vmatprep.subr.bf16.mxu1 %v2537_v1 }
0x1f45   :  { %v1403_v38 = vpop.f32.mrf.mxu1 }
0x1f46   :  { %v1409_v15 = vadd.f32 %v1403_v38, %v2935_v17 }
0x1f47   :  { %v2172_v62 = vpop.f32.mrf.mxu1 }
0x1f48   :  { %2389 = vtanh.f32 %v1409_v15  ;;  %v1900_v44 = vmul.f32 -1.442695, %v1409_v15 }
0x1f49   :  { %v1406_v39 = vpop.f32.mrf.mxu1 }
0x1f4a   :  { %2391 = vpow2.f32 %v1900_v44 }
0x1f4b   :  { %v2173_v41 = vpop.f32.mrf.mxu1 }
0x1f55   :  { %v2390_v13 = vpop.eup %2389 }
0x1f56   :  { %1419 = vrot.lane.b32.xlu0 %v2390_v13, %s2535_s0 }
0x1f57   :  { %v2392_v3 = vpop.eup %2391 }
0x1f58   :  { %v1413_v48 = vadd.f32 1.0, %v2392_v3 }
0x1f5a   :  { %2393 = vrcp.f32 %v1413_v48 }
0x1f67   :  { %v2394_v49 = vpop.eup %2393 }
0x1f68   :  { %v1417_v46 = vmul.f32 %v2394_v49, %v1343_v55 }
0x1fc8   :  { %v1420_v50 = vpop.permute.xlu0 %1419 }
0x1fc9   :  { %v1422_v51 = vmul.f32 %v2394_v49, %v1420_v50 }
0x1fcb   :  { %1424 = vrot.lane.b32.xlu1 %v1422_v51, %s2541_s18 }
0x203d   :  { %v1425_v4 = vpop.permute.xlu1 %1424 }
0x203e   :  { %v1427_v17 = vadd.f32 %v1425_v4, %v1417_v46 }
0x2040   :  { %2395 = vtanh.f32 %v1427_v17 }
0x204d   :  { %v2396_v52 = vpop.eup %2395 }
0x204e   :  { %1430 = vrot.lane.b32.xlu0 %v2396_v52, %s2535_s0 }
0x20c0   :  { %v1431_v54 = vpop.permute.xlu0 %1430 }
0x20c1   :  { %v1433_v11 = vmul.f32 %v2394_v49, %v1431_v54 }
0x20c3   :  { %1438 = vrot.lane.b32.xlu0 %v1433_v11, %s2535_s0  ;;  %1435 = vrot.lane.b32.xlu1 %v1433_v11, %s2541_s18 }
0x2135   :  { %v1439_v56 = vpop.permute.xlu0 %1438  ;;  %v1436_v16 = vpop.permute.xlu1 %1435 }
0x2136   :  { %v1441_v57 = vsel %vm289_vm5, %v1436_v16, %v1439_v56 }
0x2137   :  { %v1442_v58 = vsel %vm2670_vm7, %v1441_v57, 0.0 }
0x2138   :  { %v1448_v45 = vpack.c.bf16 %v1442_v58, %v1442_v58 }
0x213a   :  { %2183 = vmatmul.mubr.msk.bf16.vlgmr.msra.gmra.mxu0 %vm213_vm8, %v1448_v45 }
0x213b   :  { %2199 = vmatpush3.bf16.msra.mxu0 %v2883_v40  ;;  %2206 = vmatprep.mubr.msk.bf16.mxu0 %vm2538_vm0, %v2537_v1 }
0x213c   :  { %2200 = vmatprep.subr.bf16.mxu0 %v2537_v1 }
0x213f   :  { %2201 = vmatpush3.bf16.msra.mxu0 %v2888_v63 }
0x2140   :  { %2202 = vmatprep.subr.bf16.mxu0 %v2537_v1 }
0x2143   :  { %2203 = vmatpush3.bf16.msra.mxu0 %v2898_v42 }
0x2144   :  { %2204 = vmatprep.subr.bf16.mxu0 %v2537_v1 }
0x2147   :  { %2205 = vmatpush3.bf16.msra.mxu0 %v2904_v43 }
0x2148   :  { %2222 = vmatprep.subr.bf16.mxu0 %v2537_v1 }
0x21fa   :  { %v1486_v59 = vpop.f32.mrf.mxu0 }
0x21fb   :  { %v1492_v60 = vadd.f32 %v1486_v59, %v2928_v5 }
0x21fc   :  { %v2184_v61 = vpop.f32.mrf.mxu0 }
0x21fd   :  { %2397 = vtanh.f32 %v1492_v60  ;;  %v1902_v7 = vmul.f32 -1.442695, %v1492_v60 }
0x21fe   :  { %v1489_v47 = vpop.f32.mrf.mxu0 }
0x21ff   :  { %2399 = vpow2.f32 %v1902_v7 }
0x2200   :  { %v2185_v53 = vpop.f32.mrf.mxu0 }
0x220a   :  { %v2398_v6 = vpop.eup %2397 }
0x220b   :  { %1502 = vrot.lane.b32.xlu1 %v2398_v6, %s2535_s0 }
0x220c   :  { %v2400_v9 = vpop.eup %2399 }
0x220d   :  { %v1496_v10 = vadd.f32 1.0, %v2400_v9 }
0x220f   :  { %2401 = vrcp.f32 %v1496_v10 }
0x221c   :  { %v2402_v14 = vpop.eup %2401 }
0x221d   :  { %v1500_v23 = vmul.f32 %v2402_v14, %v1427_v17 }
0x227d   :  { %v1503_v19 = vpop.permute.xlu1 %1502 }
0x227e   :  { %v1505_v20 = vmul.f32 %v2402_v14, %v1503_v19 }
0x2280   :  { %1507 = vrot.lane.b32.xlu0 %v1505_v20, %s2541_s18 }
0x22f2   :  { %v1508_v0 = vpop.permute.xlu0 %1507 }
0x22f3   :  { %v1510_v5 = vadd.f32 %v1508_v0, %v1500_v23 }
0x22f5   :  { %2403 = vtanh.f32 %v1510_v5 }
0x2302   :  { %v2404_v2 = vpop.eup %2403 }
0x2303   :  { %1513 = vrot.lane.b32.xlu1 %v2404_v2, %s2535_s0 }
0x2375   :  { %v1514_v24 = vpop.permute.xlu1 %1513 }
0x2376   :  { %v1516_v25 = vmul.f32 %v2402_v14, %v1514_v24 }
0x2378   :  { %1521 = vrot.lane.b32.xlu1 %v1516_v25, %s2535_s0  ;;  %1518 = vrot.lane.b32.xlu0 %v1516_v25, %s2541_s18 }
0x23ea   :  { %v1522_v26 = vpop.permute.xlu1 %1521  ;;  %v1519_v8 = vpop.permute.xlu0 %1518 }
0x23eb   :  { %v1524_v27 = vsel %vm289_vm5, %v1519_v8, %v1522_v26 }
0x23ec   :  { %v1525_v28 = vsel %vm2670_vm7, %v1524_v27, 0.0 }
0x23ed   :  { %v1533_v29 = vpack.c.bf16 %v1525_v28, %v1525_v28  ;;  %v2293_v28 = vld [vmem:[#allocation9 + $0x88] sm:$0xff]  }
0x23ef   :  { %2195 = vmatmul.mubr.msk.bf16.vlgmr.msra.gmra.mxu1 %vm213_vm8, %v1533_v29 }
0x23f0   :  { %2211 = vmatpush3.bf16.msra.mxu1 %v2883_v40  ;;  %2218 = vmatprep.mubr.msk.bf16.mxu1 %vm2538_vm0, %v2537_v1 }
0x23f1   :  { %2212 = vmatprep.subr.bf16.mxu1 %v2537_v1 }
0x23f4   :  { %2213 = vmatpush3.bf16.msra.mxu1 %v2888_v63 }
0x23f5   :  { %2214 = vmatprep.subr.bf16.mxu1 %v2537_v1 }
0x23f8   :  { %2215 = vmatpush3.bf16.msra.mxu1 %v2898_v42 }
0x23f9   :  { %2216 = vmatprep.subr.bf16.mxu1 %v2537_v1 }
0x23fc   :  { %2217 = vmatpush3.bf16.msra.mxu1 %v2904_v43 }
0x24af   :  { %v1571_v55 = vpop.f32.mrf.mxu1 }
0x24b0   :  { %v1577_v30 = vadd.f32 %v1571_v55, %v2933_v12  ;;  %v2294_v55 = vld [vmem:[#allocation9 + $0x80] sm:$0xff]  }
0x24b1   :  { %v2196_v31 = vpop.f32.mrf.mxu1 }
0x24b2   :  { %2405 = vtanh.f32 %v1577_v30  ;;  %v1904_v34 = vmul.f32 -1.442695, %v1577_v30 }
0x24b3   :  { %v1574_v40 = vpop.f32.mrf.mxu1 }
0x24b4   :  { %2407 = vpow2.f32 %v1904_v34 }
0x24b5   :  { %v2197_v32 = vpop.f32.mrf.mxu1 }
0x24bf   :  { %v2406_v33 = vpop.eup %2405 }
0x24c0   :  { %1587 = vrot.lane.b32.xlu0 %v2406_v33, %s2535_s0 }
0x24c1   :  { %v2408_v63 = vpop.eup %2407 }
0x24c2   :  { %v1581_v35 = vadd.f32 1.0, %v2408_v63 }
0x24c4   :  { %2409 = vrcp.f32 %v1581_v35  ;;  %v1909_v35 = vld [vmem:[#allocation7 + $0x18] ss:$0 sm:$0xff] }
0x24d1   :  { %v2410_v42 = vpop.eup %2409 }
0x24d2   :  { %v1585_v43 = vmul.f32 %v2410_v42, %v1510_v5 }
0x2532   :  { %v1588_v37 = vpop.permute.xlu0 %1587 }
0x2533   :  { %v1590_v36 = vmul.f32 %v2410_v42, %v1588_v37 }
0x2535   :  { %1592 = vrot.lane.b32.xlu1 %v1590_v36, %s2541_s18 }
0x25a7   :  { %v1593_v38 = vpop.permute.xlu1 %1592 }
0x25a8   :  { %v1595_v12 = vadd.f32 %v1593_v38, %v1585_v43 }
0x25aa   :  { %2411 = vtanh.f32 %v1595_v12 }
0x25b7   :  { %v2412_v15 = vpop.eup %2411 }
0x25b8   :  { %1598 = vrot.lane.b32.xlu0 %v2412_v15, %s2535_s0 }
0x262a   :  { %v1599_v62 = vpop.permute.xlu0 %1598 }
0x262b   :  { %v1601_v39 = vmul.f32 %v2410_v42, %v1599_v62 }
0x262d   :  { %1606 = vrot.lane.b32.xlu0 %v1601_v39, %s2535_s0  ;;  %1603 = vrot.lane.b32.xlu1 %v1601_v39, %s2541_s18 }
0x269f   :  { %v1607_v41 = vpop.permute.xlu0 %1606  ;;  %v1604_v13 = vpop.permute.xlu1 %1603 }
0x26a0   :  { %v1609_v44 = vsel %vm289_vm5, %v1604_v13, %v1607_v41 }
0x26a1   :  { %v1610_v3 = vsel %vm2670_vm7, %v1609_v44, 0.0 }
0x26a2   :  { %v1615_v48 = vpack.c.bf16 %v1610_v3, %v1610_v3 }
0x26a4   :  { %2207 = vmatmul.mubr.msk.bf16.vlgmr.msra.gmra.mxu0 %vm213_vm8, %v1615_v48 }
0x26a5   :  { %2226 = vmatprep.mubr.msk.bf16.mxu0 %vm2538_vm0, %v2537_v1  ;;  %2223 = vmatpush3.bf16.msra.mxu0 %v2293_v28 }
0x26a6   :  { %2224 = vmatprep.subr.bf16.mxu0 %v2537_v1 }
0x26a9   :  { %2225 = vmatpush3.bf16.msra.mxu0 %v2294_v55 }
0x2764   :  { %v1653_v49 = vpop.f32.mrf.mxu0 }
0x2765   :  { %v1659_v50 = vadd.f32 %v1653_v49, %v2939_v21 }
0x2766   :  { %v2208_v51 = vpop.f32.mrf.mxu0 }
0x2767   :  { %2413 = vtanh.f32 %v1659_v50  ;;  %v1906_v52 = vmul.f32 -1.442695, %v1659_v50 }
0x2768   :  { %v1656_v46 = vpop.f32.mrf.mxu0 }
0x2769   :  { %2415 = vpow2.f32 %v1906_v52 }
0x276a   :  { %v2209_v4 = vpop.f32.mrf.mxu0 }
0x2774   :  { %v2414_v17 = vpop.eup %2413 }
0x2775   :  { %1669 = vrot.lane.b32.xlu1 %v2414_v17, %s2535_s0 }
0x2776   :  { %v2416_v54 = vpop.eup %2415 }
0x2777   :  { %v1663_v11 = vadd.f32 1.0, %v2416_v54 }
0x2779   :  { %2417 = vrcp.f32 %v1663_v11 }
0x2786   :  { %v2418_v56 = vpop.eup %2417 }
0x2787   :  { %v1667_v58 = vmul.f32 %v2418_v56, %v1595_v12 }
0x27e7   :  { %v1670_v16 = vpop.permute.xlu1 %1669 }
0x27e8   :  { %v1672_v57 = vmul.f32 %v2418_v56, %v1670_v16 }
0x27ea   :  { %1674 = vrot.lane.b32.xlu0 %v1672_v57, %s2541_s18 }
0x285c   :  { %v1675_v45 = vpop.permute.xlu0 %1674 }
0x285d   :  { %v1677_v21 = vadd.f32 %v1675_v45, %v1667_v58 }
0x285f   :  { %2419 = vtanh.f32 %v1677_v21 }
0x286c   :  { %v2420_v59 = vpop.eup %2419 }
0x286d   :  { %1680 = vrot.lane.b32.xlu1 %v2420_v59, %s2535_s0 }
0x28df   :  { %v1681_v60 = vpop.permute.xlu1 %1680 }
0x28e0   :  { %v1683_v61 = vmul.f32 %v2418_v56, %v1681_v60 }
0x28e2   :  { %1688 = vrot.lane.b32.xlu1 %v1683_v61, %s2535_s0  ;;  %1685 = vrot.lane.b32.xlu0 %v1683_v61, %s2541_s18 }
0x2954   :  { %v1689_v47 = vpop.permute.xlu1 %1688  ;;  %v1686_v53 = vpop.permute.xlu0 %1685 }
0x2955   :  { %v1691_v6 = vsel %vm289_vm5, %v1686_v53, %v1689_v47 }
0x2956   :  { %v1692_v7 = vsel %vm2670_vm7, %v1691_v6, 0.0 }
0x2957   :  { %v1699_v9 = vpack.c.bf16 %v1692_v7, %v1692_v7 }
0x2959   :  { %2219 = vmatmul.mubr.msk.bf16.vlgmr.msra.gmra.mxu1 %vm213_vm8, %v1699_v9 }
0x2a19   :  { %v1737_v10 = vpop.f32.mrf.mxu1 }
0x2a1a   :  { %v1743_v14 = vadd.f32 %v1737_v10, %v2941_v22 }
0x2a1b   :  { %v2220_v19 = vpop.f32.mrf.mxu1 }
0x2a1c   :  { %2421 = vtanh.f32 %v1743_v14  ;;  %v1908_v5 = vmul.f32 -1.442695, %v1743_v14 }
0x2a1d   :  { %v1740_v20 = vpop.f32.mrf.mxu1 }
0x2a1e   :  { %2423 = vpow2.f32 %v1908_v5 }
0x2a1f   :  { %v2221_v23 = vpop.f32.mrf.mxu1 }
0x2a29   :  { %v2422_v0 = vpop.eup %2421 }
0x2a2a   :  { %1753 = vrot.lane.b32.xlu0 %v2422_v0, %s2535_s0 }
0x2a2b   :  { %v2424_v2 = vpop.eup %2423 }
0x2a2c   :  { %v1747_v24 = vadd.f32 1.0, %v2424_v2 }
0x2a2e   :  { %2425 = vrcp.f32 %v1747_v24 }
0x2a3b   :  { %v2426_v18 = vpop.eup %2425 }
0x2a3c   :  { %v1751_v8 = vmul.f32 %v2426_v18, %v1677_v21 }
0x2a9c   :  { %v1754_v25 = vpop.permute.xlu0 %1753 }
0x2a9d   :  { %v1756_v26 = vmul.f32 %v2426_v18, %v1754_v25 }
0x2a9f   :  { %1758 = vrot.lane.b32.xlu1 %v1756_v26, %s2541_s18 }
0x2b11   :  { %v1759_v27 = vpop.permute.xlu1 %1758 }
0x2b12   :  { %v1761_v22 = vadd.f32 %v1759_v27, %v1751_v8 }
0x2b14   :  { %2427 = vtanh.f32 %v1761_v22 }
0x2b21   :  { %v2428_v29 = vpop.eup %2427 }
0x2b22   :  { %1764 = vrot.lane.b32.xlu0 %v2428_v29, %s2535_s0 }
0x2b94   :  { %v1765_v30 = vpop.permute.xlu0 %1764 }
0x2b95   :  { %v1767_v31 = vmul.f32 %v2426_v18, %v1765_v30 }
0x2b97   :  { %v1769_v40 = vrot.slane %v1767_v31, 2 }
0x2b99   :  { %v1771_v32 = vadd.f32 %v1769_v40, %v1767_v31 }
0x2b9b   :  { %v1772_v33 = vmul.f32 0.5, %v1771_v32 }
0x2b9d   :  { %v1773_v34 = vpack.c.bf16 %v1772_v33, %v1772_v33 }
0x2b9f   :  { %1779 = vrot.lane.b32.xlu1 %v1773_v34, %s2541_s18 }
0x2c11   :  { %v1780_v63 = vpop.permute.xlu1 %1779 }
0x2c12   :  { %2227 = vmatmul.mubr.msk.bf16.vlgmr.msra.gmra.mxu0 %vm289_vm5, %v1780_v63 }
0x2cd2   :  { %v1830_v42 = vpop.f32.mrf.mxu0 }
0x2cd3   :  { %v1831_v37 = vadd.f32 %v1909_v35, %v1830_v42 }
0x2cd4   :  { %v2228_v36 = vpop.f32.mrf.mxu0 }
0x2cd5   :  { %1836 = vst [vmem:[#allocation10] sm:$0x3] %v1831_v37 }
0x2cd6   :  { %v1833_v1 = vpop.f32.mrf.mxu0 }
0x2cd7   :  { %2512 = shalt.err (!%p2509_p10)
}
0x2cd8   :  { %1846 = dma.vmem_to_hbm [thread:$0]  %s1844_s27, 32, %s3077_s4, [#allocation4]   ;;  %v2229_v43 = vpop.f32.mrf.mxu0 }
0x2cd9   :  { %2527 = dma.done.wait [#allocation4], 32  }
0x2cda   :  { %2528 = vsyncadd [#allocation4], 4294967264 }
0x2cdb   :  { %1850 = vsyncpa [#allocation3], 1 }
0x2cdc   :  { %1851 = vsyncpa [#allocation8], 1 }
0x2cdd   :  { %1852 = vsyncpa [#allocation4], 1 }
0x2cde   :  { %1853 = vsyncpa [#allocation5], 1 }

</bundles_post_ra>
